<compile_context>
chip_gen: v7x
topology: tpu7x:2x2x1
jax: 0.10.0
libtpu: 0.0.40
codegen_flags: <defaults>
</compile_context>

<pallas_src>
import jax
import jax.numpy as jnp
import numpy as np
from jax.experimental import pallas as pl
from jax.experimental.pallas import tpu as pltpu

H = 16
W = 16
HW = H * W

# Tap order t = (dy+1)*3 + (dx+1)  (matches the fused-weight layouts below).
SHIFTS = tuple(dy * W + dx for dy in (-1, 0, 1) for dx in (-1, 0, 1))


def punchnet_kernel(mask_ref, x_ref, w1_ref, b1_ref, w2_ref, b2_ref,
                    w3_ref, b3_ref, o_ref):
    n = x_ref.shape[-1]                       # TB*HW (static, multiple of 128)
    x = x_ref[0]                              # (1, n)   pixels on lanes

    def tap(v, t, d):
        """v[p] -> v[p + d] via a lane roll, zeroing spatially-invalid lanes.

        The center tap (d == 0) is always valid, so it skips both the roll and
        the mask multiply (review: don't select on an all-true mask).
        """
        if d == 0:
            return v
        s = pltpu.roll(v, shift=(-d) % n, axis=1)
        return mask_ref[pl.ds(t, 1), :] * s   # (1,n) mask broadcasts over rows

    # ---- conv1: cin=1 -> 9 broadcast multiply-adds on the VPU (no matmul) --
    w1 = w1_ref[...]                          # (16, 9)
    acc1 = None
    for t, d in enumerate(SHIFTS):
        term = w1[:, t:t + 1] * tap(x, t, d)  # (16,1)*(1,n) -> (16,n)
        acc1 = term if acc1 is None else acc1 + term
    h1 = jnp.maximum(acc1 + b1_ref[...], 0.0)                       # (16, n)

    # ---- conv2: accumulate 9 (16,16)@(16,n) dots (no im2col materialization)
    acc2 = None
    for t, d in enumerate(SHIFTS):
        term = jnp.dot(w2_ref[t], tap(h1, t, d),
                       preferred_element_type=jnp.float32)          # (16, n)
        acc2 = term if acc2 is None else acc2 + term
    h2 = jnp.maximum(acc2 + b2_ref[...], 0.0)                       # (16, n)

    # ---- conv3 (cout=1), contract-first: channel contraction commutes with
    # the spatial shift, so do ONE (9,16)@(16,n) dot, then roll/mask/sum the
    # nine resulting (1,n) rows (16x less roll data than rolling h2).
    g = jnp.dot(w3_ref[...], h2, preferred_element_type=jnp.float32)  # (9, n)
    acc3 = None
    for t, d in enumerate(SHIFTS):
        term = tap(g[t:t + 1, :], t, d)                             # (1, n)
        acc3 = term if acc3 is None else acc3 + term
    h3 = acc3 + b3_ref[...]                                         # (1, n)

    o_ref[0] = jnp.clip(jnp.tanh(h3), -0.5, 0.5)    # lane-dense store


def _tap_masks(tb):
    """(9, tb*HW) f32 spatial-validity masks, periodic per image (host-built)."""
    yy, xx = np.meshgrid(np.arange(H), np.arange(W), indexing="ij")
    yy = yy.reshape(1, HW)
    xx = xx.reshape(1, HW)
    dy = np.repeat(np.array([-1, 0, 1]), 3).reshape(9, 1)
    dx = np.tile(np.array([-1, 0, 1]), 3).reshape(9, 1)
    valid = ((yy + dy) >= 0) & ((yy + dy) < H) & ((xx + dx) >= 0) & ((xx + dx) < W)
    return jnp.asarray(np.tile(valid.astype(np.float32), (1, tb)))


def punchnet_forward(x_nchw, params, batch_tile=32):
    """x_nchw: (B, 1, H, W) f32.  Returns (B, 1, H, W) f32.

    batch_tile=32 keeps per-step live VMEM ~3-5 MiB (no im2col); <=64 is safe
    on all of v5e/v6e/v7x with the 32 MiB vmem limit set below.
    """
    (w1, b1), (w2, b2), (w3, b3) = params
    B = x_nchw.shape[0]
    TB = int(min(batch_tile, B))              # images per grid step
    # v7x has 2 TensorCores; if the whole batch fits in one tile, split it so
    # the grid has >=2 "parallel" steps instead of idling a core.
    if B == TB and B > 1:
        TB = (B + 1) // 2
    Bp = ((B + TB - 1) // TB) * TB            # pad batch to a multiple of TB
    G = Bp // TB
    n = TB * HW                               # lane extent (multiple of 128)

    x = x_nchw.astype(jnp.float32).reshape(B, HW)
    if Bp != B:
        x = jnp.concatenate([x, jnp.zeros((Bp - B, HW), jnp.float32)], axis=0)
    x_flat = x.reshape(G, 1, n)               # TB images' pixels on lanes

    masks = _tap_masks(TB)                    # (9, n) resident VMEM input

    # Fused weight layouts (HWIO -> tap-major), tap t = ky*3 + kx:
    w1f = jnp.asarray(w1).reshape(9, 16).T                        # (16, 9)  [c,t]
    w2f = jnp.asarray(w2).reshape(9, 16, 16).transpose(0, 2, 1)   # (9, cout, cin)
    w3f = jnp.asarray(w3).reshape(9, 16)                          # (9, cin)
    b1f = jnp.asarray(b1).reshape(16, 1)
    b2f = jnp.asarray(b2).reshape(16, 1)
    b3f = jnp.asarray(b3).reshape(1, 1)

    out = pl.pallas_call(
        punchnet_kernel,
        out_shape=jax.ShapeDtypeStruct((G, 1, n), jnp.float32),
        grid=(G,),
        in_specs=[
            pl.BlockSpec((9, n), lambda g: (0, 0)),          # tap masks (resident)
            pl.BlockSpec((1, 1, n), lambda g: (g, 0, 0)),    # x (TB images / step)
            pl.BlockSpec((16, 9), lambda g: (0, 0)),         # w1 fused
            pl.BlockSpec((16, 1), lambda g: (0, 0)),         # b1
            pl.BlockSpec((9, 16, 16), lambda g: (0, 0, 0)),  # w2 per-tap
            pl.BlockSpec((16, 1), lambda g: (0, 0)),         # b2
            pl.BlockSpec((9, 16), lambda g: (0, 0)),         # w3 per-tap
            pl.BlockSpec((1, 1), lambda g: (0, 0)),          # b3
        ],
        out_specs=pl.BlockSpec((1, 1, n), lambda g: (g, 0, 0)),  # lane-dense store
        compiler_params=pltpu.CompilerParams(
            dimension_semantics=("parallel",),
            vmem_limit_bytes=32 * 1024 * 1024),
    )(masks, x_flat, w1f, b1f, w2f, b2f, w3f, b3f)

    return out.reshape(Bp, 1, H, W)[:B]


def init_params(key):
    # Deterministic init mimicking torch Conv2d defaults (uniform +-1/sqrt(fan_in)).
    def conv_init(k, cin, cout):
        k1, k2 = jax.random.split(k)
        bound = 1.0 / np.sqrt(cin * 9)
        w = jax.random.uniform(k1, (3, 3, cin, cout), jnp.float32, -bound, bound)
        b = jax.random.uniform(k2, (cout,), jnp.float32, -bound, bound)
        return w, b
    k1, k2, k3 = jax.random.split(key, 3)
    return (conv_init(k1, 1, 16), conv_init(k2, 16, 16), conv_init(k3, 16, 1))


def punchnet_ref(x_nchw, params):
    # Pure-JAX reference (matches torch semantics) for a correctness check.
    (w1, b1), (w2, b2), (w3, b3) = params
    x = jnp.transpose(x_nchw, (0, 2, 3, 1))                  # NHWC

    def conv(h, w, b):
        y = jax.lax.conv_general_dilated(
            h, w, window_strides=(1, 1), padding="SAME",
            dimension_numbers=("NHWC", "HWIO", "NHWC"))
        return y + b

    h = jax.nn.relu(conv(x, w1, b1))
    h = jax.nn.relu(conv(h, w2, b2))
    h = jnp.clip(jnp.tanh(conv(h, w3, b3)), -0.5, 0.5)
    return jnp.transpose(h, (0, 3, 1, 2))                    # back to NCHW


if __name__ == "__main__":
    key = jax.random.PRNGKey(0)
    kx, kx2, kp = jax.random.split(key, 3)
    params = init_params(kp)

    # Test 1: small batch (B=2) -> split into 2 grid steps of 1 image each.
    x = jax.random.normal(kx, (2, 1, H, W), jnp.float32)     # NCHW like PyTorch
    out = jax.block_until_ready(punchnet_forward(x, params))
    assert out.shape == (2, 1, H, W)
    np.testing.assert_allclose(np.asarray(out), np.asarray(punchnet_ref(x, params)),
                               atol=1e-4, rtol=1e-4)

    # Test 2: batch not divisible by the tile (exercises padding + multi-step grid).
    x2 = jax.random.normal(kx2, (5, 1, H, W), jnp.float32)
    out2 = jax.block_until_ready(punchnet_forward(x2, params, batch_tile=2))
    assert out2.shape == (5, 1, H, W)
    np.testing.assert_allclose(np.asarray(out2), np.asarray(punchnet_ref(x2, params)),
                               atol=1e-4, rtol=1e-4)

    print("KERNEL_OK")
</pallas_src>

<mosaic_0001>
module attributes {stable_mosaic.version = 11 : i64} {
  func.func @punchnet_kernel(%arg0: i32, %arg1: memref<9x256xf32, #tpu.memory_space<vmem>>, %arg2: memref<1x1x256xf32, #tpu.memory_space<vmem>>, %arg3: memref<16x9xf32, #tpu.memory_space<vmem>>, %arg4: memref<16x1xf32, #tpu.memory_space<vmem>>, %arg5: memref<9x16x16xf32, #tpu.memory_space<vmem>>, %arg6: memref<16x1xf32, #tpu.memory_space<vmem>>, %arg7: memref<9x16xf32, #tpu.memory_space<vmem>>, %arg8: memref<1x1xf32, #tpu.memory_space<vmem>>, %arg9: memref<1x1x256xf32, #tpu.memory_space<vmem>>) attributes {dimension_semantics = [#tpu.dimension_semantics<parallel>], iteration_bounds = array<i64: 2>, scalar_prefetch = 0 : i64, scratch_operands = 0 : i64, tpu.core_type = #tpu.core_type<tc>, window_params = [{pipeline_mode = #tpu.pipeline_mode<synchronous>, transform_indices = @transform_0, window_bounds = array<i64: 9, 256>}, {transform_indices = @transform_1, window_bounds = array<i64: 1, 1, 256>}, {pipeline_mode = #tpu.pipeline_mode<synchronous>, transform_indices = @transform_2, window_bounds = array<i64: 16, 9>}, {pipeline_mode = #tpu.pipeline_mode<synchronous>, transform_indices = @transform_3, window_bounds = array<i64: 16, 1>}, {pipeline_mode = #tpu.pipeline_mode<synchronous>, transform_indices = @transform_4, window_bounds = array<i64: 9, 16, 16>}, {pipeline_mode = #tpu.pipeline_mode<synchronous>, transform_indices = @transform_5, window_bounds = array<i64: 16, 1>}, {pipeline_mode = #tpu.pipeline_mode<synchronous>, transform_indices = @transform_6, window_bounds = array<i64: 9, 16>}, {pipeline_mode = #tpu.pipeline_mode<synchronous>, transform_indices = @transform_7, window_bounds = array<i64: 1, 1>}, {transform_indices = @transform_8, window_bounds = array<i64: 1, 1, 256>}]} {
    %c0 = arith.constant 0 : index
    %c0_0 = arith.constant 0 : index
    %c0_1 = arith.constant 0 : index
    %0 = vector.load %arg2[%c0, %c0_0, %c0_1] : memref<1x1x256xf32, #tpu.memory_space<vmem>>, vector<1x1x256xf32>
    %1 = vector.shape_cast %0 : vector<1x1x256xf32> to vector<1x256xf32>
    %c0_2 = arith.constant 0 : index
    %c0_3 = arith.constant 0 : index
    %2 = vector.load %arg3[%c0_2, %c0_3] : memref<16x9xf32, #tpu.memory_space<vmem>>, vector<16x9xf32>
    %3 = vector.extract_strided_slice %2 {offsets = [0, 0], sizes = [16, 1], strides = [1, 1]} : vector<16x9xf32> to vector<16x1xf32>
    %c17_i32 = arith.constant 17 : i32
    %4 = tpu.dynamic_rotate %1 by %c17_i32 dim 1 : vector<1x256xf32>, i32 -> vector<1x256xf32>
    %c0_4 = arith.constant 0 : index
    %c0_5 = arith.constant 0 : index
    %5 = vector.load %arg1[%c0_4, %c0_5] : memref<9x256xf32, #tpu.memory_space<vmem>>, vector<1x256xf32>
    %6 = arith.mulf %5, %4 : vector<1x256xf32>
    %7 = vector.broadcast %3 : vector<16x1xf32> to vector<16x256xf32>
    %8 = vector.broadcast %6 : vector<1x256xf32> to vector<16x256xf32>
    %9 = arith.mulf %7, %8 : vector<16x256xf32>
    %10 = vector.extract_strided_slice %2 {offsets = [0, 1], sizes = [16, 1], strides = [1, 1]} : vector<16x9xf32> to vector<16x1xf32>
    %c16_i32 = arith.constant 16 : i32
    %11 = tpu.dynamic_rotate %1 by %c16_i32 dim 1 : vector<1x256xf32>, i32 -> vector<1x256xf32>
    %c1 = arith.constant 1 : index
    %c0_6 = arith.constant 0 : index
    %12 = vector.load %arg1[%c1, %c0_6] : memref<9x256xf32, #tpu.memory_space<vmem>>, vector<1x256xf32>
    %13 = arith.mulf %12, %11 : vector<1x256xf32>
    %14 = vector.broadcast %10 : vector<16x1xf32> to vector<16x256xf32>
    %15 = vector.broadcast %13 : vector<1x256xf32> to vector<16x256xf32>
    %16 = arith.mulf %14, %15 : vector<16x256xf32>
    %17 = arith.addf %9, %16 : vector<16x256xf32>
    %18 = vector.extract_strided_slice %2 {offsets = [0, 2], sizes = [16, 1], strides = [1, 1]} : vector<16x9xf32> to vector<16x1xf32>
    %c15_i32 = arith.constant 15 : i32
    %19 = tpu.dynamic_rotate %1 by %c15_i32 dim 1 : vector<1x256xf32>, i32 -> vector<1x256xf32>
    %c2 = arith.constant 2 : index
    %c0_7 = arith.constant 0 : index
    %20 = vector.load %arg1[%c2, %c0_7] : memref<9x256xf32, #tpu.memory_space<vmem>>, vector<1x256xf32>
    %21 = arith.mulf %20, %19 : vector<1x256xf32>
    %22 = vector.broadcast %18 : vector<16x1xf32> to vector<16x256xf32>
    %23 = vector.broadcast %21 : vector<1x256xf32> to vector<16x256xf32>
    %24 = arith.mulf %22, %23 : vector<16x256xf32>
    %25 = arith.addf %17, %24 : vector<16x256xf32>
    %26 = vector.extract_strided_slice %2 {offsets = [0, 3], sizes = [16, 1], strides = [1, 1]} : vector<16x9xf32> to vector<16x1xf32>
    %c1_i32 = arith.constant 1 : i32
    %27 = tpu.dynamic_rotate %1 by %c1_i32 dim 1 : vector<1x256xf32>, i32 -> vector<1x256xf32>
    %c3 = arith.constant 3 : index
    %c0_8 = arith.constant 0 : index
    %28 = vector.load %arg1[%c3, %c0_8] : memref<9x256xf32, #tpu.memory_space<vmem>>, vector<1x256xf32>
    %29 = arith.mulf %28, %27 : vector<1x256xf32>
    %30 = vector.broadcast %26 : vector<16x1xf32> to vector<16x256xf32>
    %31 = vector.broadcast %29 : vector<1x256xf32> to vector<16x256xf32>
    %32 = arith.mulf %30, %31 : vector<16x256xf32>
    %33 = arith.addf %25, %32 : vector<16x256xf32>
    %34 = vector.extract_strided_slice %2 {offsets = [0, 4], sizes = [16, 1], strides = [1, 1]} : vector<16x9xf32> to vector<16x1xf32>
    %35 = vector.broadcast %34 : vector<16x1xf32> to vector<16x256xf32>
    %36 = vector.broadcast %1 : vector<1x256xf32> to vector<16x256xf32>
    %37 = arith.mulf %35, %36 : vector<16x256xf32>
    %38 = arith.addf %33, %37 : vector<16x256xf32>
    %39 = vector.extract_strided_slice %2 {offsets = [0, 5], sizes = [16, 1], strides = [1, 1]} : vector<16x9xf32> to vector<16x1xf32>
    %c255_i32 = arith.constant 255 : i32
    %40 = tpu.dynamic_rotate %1 by %c255_i32 dim 1 : vector<1x256xf32>, i32 -> vector<1x256xf32>
    %c5 = arith.constant 5 : index
    %c0_9 = arith.constant 0 : index
    %41 = vector.load %arg1[%c5, %c0_9] : memref<9x256xf32, #tpu.memory_space<vmem>>, vector<1x256xf32>
    %42 = arith.mulf %41, %40 : vector<1x256xf32>
    %43 = vector.broadcast %39 : vector<16x1xf32> to vector<16x256xf32>
    %44 = vector.broadcast %42 : vector<1x256xf32> to vector<16x256xf32>
    %45 = arith.mulf %43, %44 : vector<16x256xf32>
    %46 = arith.addf %38, %45 : vector<16x256xf32>
    %47 = vector.extract_strided_slice %2 {offsets = [0, 6], sizes = [16, 1], strides = [1, 1]} : vector<16x9xf32> to vector<16x1xf32>
    %c241_i32 = arith.constant 241 : i32
    %48 = tpu.dynamic_rotate %1 by %c241_i32 dim 1 : vector<1x256xf32>, i32 -> vector<1x256xf32>
    %c6 = arith.constant 6 : index
    %c0_10 = arith.constant 0 : index
    %49 = vector.load %arg1[%c6, %c0_10] : memref<9x256xf32, #tpu.memory_space<vmem>>, vector<1x256xf32>
    %50 = arith.mulf %49, %48 : vector<1x256xf32>
    %51 = vector.broadcast %47 : vector<16x1xf32> to vector<16x256xf32>
    %52 = vector.broadcast %50 : vector<1x256xf32> to vector<16x256xf32>
    %53 = arith.mulf %51, %52 : vector<16x256xf32>
    %54 = arith.addf %46, %53 : vector<16x256xf32>
    %55 = vector.extract_strided_slice %2 {offsets = [0, 7], sizes = [16, 1], strides = [1, 1]} : vector<16x9xf32> to vector<16x1xf32>
    %c240_i32 = arith.constant 240 : i32
    %56 = tpu.dynamic_rotate %1 by %c240_i32 dim 1 : vector<1x256xf32>, i32 -> vector<1x256xf32>
    %c7 = arith.constant 7 : index
    %c0_11 = arith.constant 0 : index
    %57 = vector.load %arg1[%c7, %c0_11] : memref<9x256xf32, #tpu.memory_space<vmem>>, vector<1x256xf32>
    %58 = arith.mulf %57, %56 : vector<1x256xf32>
    %59 = vector.broadcast %55 : vector<16x1xf32> to vector<16x256xf32>
    %60 = vector.broadcast %58 : vector<1x256xf32> to vector<16x256xf32>
    %61 = arith.mulf %59, %60 : vector<16x256xf32>
    %62 = arith.addf %54, %61 : vector<16x256xf32>
    %63 = vector.extract_strided_slice %2 {offsets = [0, 8], sizes = [16, 1], strides = [1, 1]} : vector<16x9xf32> to vector<16x1xf32>
    %c239_i32 = arith.constant 239 : i32
    %64 = tpu.dynamic_rotate %1 by %c239_i32 dim 1 : vector<1x256xf32>, i32 -> vector<1x256xf32>
    %c8 = arith.constant 8 : index
    %c0_12 = arith.constant 0 : index
    %65 = vector.load %arg1[%c8, %c0_12] : memref<9x256xf32, #tpu.memory_space<vmem>>, vector<1x256xf32>
    %66 = arith.mulf %65, %64 : vector<1x256xf32>
    %67 = vector.broadcast %63 : vector<16x1xf32> to vector<16x256xf32>
    %68 = vector.broadcast %66 : vector<1x256xf32> to vector<16x256xf32>
    %69 = arith.mulf %67, %68 : vector<16x256xf32>
    %70 = arith.addf %62, %69 : vector<16x256xf32>
    %c0_13 = arith.constant 0 : index
    %c0_14 = arith.constant 0 : index
    %71 = vector.load %arg4[%c0_13, %c0_14] : memref<16x1xf32, #tpu.memory_space<vmem>>, vector<16x1xf32>
    %72 = vector.broadcast %71 : vector<16x1xf32> to vector<16x256xf32>
    %73 = arith.addf %70, %72 : vector<16x256xf32>
    %cst = arith.constant 0.000000e+00 : f32
    %74 = vector.broadcast %cst : f32 to vector<16x256xf32>
    %75 = arith.maximumf %73, %74 : vector<16x256xf32>
    %c0_15 = arith.constant 0 : index
    %c0_16 = arith.constant 0 : index
    %c0_17 = arith.constant 0 : index
    %76 = vector.load %arg5[%c0_15, %c0_16, %c0_17] : memref<9x16x16xf32, #tpu.memory_space<vmem>>, vector<1x16x16xf32>
    %77 = vector.shape_cast %76 : vector<1x16x16xf32> to vector<16x16xf32>
    %c17_i32_18 = arith.constant 17 : i32
    %78 = tpu.dynamic_rotate %75 by %c17_i32_18 dim 1 : vector<16x256xf32>, i32 -> vector<16x256xf32>
    %c0_19 = arith.constant 0 : index
    %c0_20 = arith.constant 0 : index
    %79 = vector.load %arg1[%c0_19, %c0_20] : memref<9x256xf32, #tpu.memory_space<vmem>>, vector<1x256xf32>
    %80 = vector.broadcast %79 : vector<1x256xf32> to vector<16x256xf32>
    %81 = arith.mulf %80, %78 : vector<16x256xf32>
    %cst_21 = arith.constant dense<0.000000e+00> : vector<16x256xf32>
    %82 = tpu.matmul %77, %81, %cst_21 {dimension_numbers = #tpu.dot_dimension_numbers<[1], [0], [0], [1], [0, 0, 1, 1], [], []>} : vector<16x16xf32>, vector<16x256xf32>, vector<16x256xf32> -> vector<16x256xf32>
    %c1_22 = arith.constant 1 : index
    %c0_23 = arith.constant 0 : index
    %c0_24 = arith.constant 0 : index
    %83 = vector.load %arg5[%c1_22, %c0_23, %c0_24] : memref<9x16x16xf32, #tpu.memory_space<vmem>>, vector<1x16x16xf32>
    %84 = vector.shape_cast %83 : vector<1x16x16xf32> to vector<16x16xf32>
    %c16_i32_25 = arith.constant 16 : i32
    %85 = tpu.dynamic_rotate %75 by %c16_i32_25 dim 1 : vector<16x256xf32>, i32 -> vector<16x256xf32>
    %c1_26 = arith.constant 1 : index
    %c0_27 = arith.constant 0 : index
    %86 = vector.load %arg1[%c1_26, %c0_27] : memref<9x256xf32, #tpu.memory_space<vmem>>, vector<1x256xf32>
    %87 = vector.broadcast %86 : vector<1x256xf32> to vector<16x256xf32>
    %88 = arith.mulf %87, %85 : vector<16x256xf32>
    %cst_28 = arith.constant dense<0.000000e+00> : vector<16x256xf32>
    %89 = tpu.matmul %84, %88, %cst_28 {dimension_numbers = #tpu.dot_dimension_numbers<[1], [0], [0], [1], [0, 0, 1, 1], [], []>} : vector<16x16xf32>, vector<16x256xf32>, vector<16x256xf32> -> vector<16x256xf32>
    %90 = arith.addf %82, %89 : vector<16x256xf32>
    %c2_29 = arith.constant 2 : index
    %c0_30 = arith.constant 0 : index
    %c0_31 = arith.constant 0 : index
    %91 = vector.load %arg5[%c2_29, %c0_30, %c0_31] : memref<9x16x16xf32, #tpu.memory_space<vmem>>, vector<1x16x16xf32>
    %92 = vector.shape_cast %91 : vector<1x16x16xf32> to vector<16x16xf32>
    %c15_i32_32 = arith.constant 15 : i32
    %93 = tpu.dynamic_rotate %75 by %c15_i32_32 dim 1 : vector<16x256xf32>, i32 -> vector<16x256xf32>
    %c2_33 = arith.constant 2 : index
    %c0_34 = arith.constant 0 : index
    %94 = vector.load %arg1[%c2_33, %c0_34] : memref<9x256xf32, #tpu.memory_space<vmem>>, vector<1x256xf32>
    %95 = vector.broadcast %94 : vector<1x256xf32> to vector<16x256xf32>
    %96 = arith.mulf %95, %93 : vector<16x256xf32>
    %cst_35 = arith.constant dense<0.000000e+00> : vector<16x256xf32>
    %97 = tpu.matmul %92, %96, %cst_35 {dimension_numbers = #tpu.dot_dimension_numbers<[1], [0], [0], [1], [0, 0, 1, 1], [], []>} : vector<16x16xf32>, vector<16x256xf32>, vector<16x256xf32> -> vector<16x256xf32>
    %98 = arith.addf %90, %97 : vector<16x256xf32>
    %c3_36 = arith.constant 3 : index
    %c0_37 = arith.constant 0 : index
    %c0_38 = arith.constant 0 : index
    %99 = vector.load %arg5[%c3_36, %c0_37, %c0_38] : memref<9x16x16xf32, #tpu.memory_space<vmem>>, vector<1x16x16xf32>
    %100 = vector.shape_cast %99 : vector<1x16x16xf32> to vector<16x16xf32>
    %c1_i32_39 = arith.constant 1 : i32
    %101 = tpu.dynamic_rotate %75 by %c1_i32_39 dim 1 : vector<16x256xf32>, i32 -> vector<16x256xf32>
    %c3_40 = arith.constant 3 : index
    %c0_41 = arith.constant 0 : index
    %102 = vector.load %arg1[%c3_40, %c0_41] : memref<9x256xf32, #tpu.memory_space<vmem>>, vector<1x256xf32>
    %103 = vector.broadcast %102 : vector<1x256xf32> to vector<16x256xf32>
    %104 = arith.mulf %103, %101 : vector<16x256xf32>
    %cst_42 = arith.constant dense<0.000000e+00> : vector<16x256xf32>
    %105 = tpu.matmul %100, %104, %cst_42 {dimension_numbers = #tpu.dot_dimension_numbers<[1], [0], [0], [1], [0, 0, 1, 1], [], []>} : vector<16x16xf32>, vector<16x256xf32>, vector<16x256xf32> -> vector<16x256xf32>
    %106 = arith.addf %98, %105 : vector<16x256xf32>
    %c4 = arith.constant 4 : index
    %c0_43 = arith.constant 0 : index
    %c0_44 = arith.constant 0 : index
    %107 = vector.load %arg5[%c4, %c0_43, %c0_44] : memref<9x16x16xf32, #tpu.memory_space<vmem>>, vector<1x16x16xf32>
    %108 = vector.shape_cast %107 : vector<1x16x16xf32> to vector<16x16xf32>
    %cst_45 = arith.constant dense<0.000000e+00> : vector<16x256xf32>
    %109 = tpu.matmul %108, %75, %cst_45 {dimension_numbers = #tpu.dot_dimension_numbers<[1], [0], [0], [1], [0, 0, 1, 1], [], []>} : vector<16x16xf32>, vector<16x256xf32>, vector<16x256xf32> -> vector<16x256xf32>
    %110 = arith.addf %106, %109 : vector<16x256xf32>
    %c5_46 = arith.constant 5 : index
    %c0_47 = arith.constant 0 : index
    %c0_48 = arith.constant 0 : index
    %111 = vector.load %arg5[%c5_46, %c0_47, %c0_48] : memref<9x16x16xf32, #tpu.memory_space<vmem>>, vector<1x16x16xf32>
    %112 = vector.shape_cast %111 : vector<1x16x16xf32> to vector<16x16xf32>
    %c255_i32_49 = arith.constant 255 : i32
    %113 = tpu.dynamic_rotate %75 by %c255_i32_49 dim 1 : vector<16x256xf32>, i32 -> vector<16x256xf32>
    %c5_50 = arith.constant 5 : index
    %c0_51 = arith.constant 0 : index
    %114 = vector.load %arg1[%c5_50, %c0_51] : memref<9x256xf32, #tpu.memory_space<vmem>>, vector<1x256xf32>
    %115 = vector.broadcast %114 : vector<1x256xf32> to vector<16x256xf32>
    %116 = arith.mulf %115, %113 : vector<16x256xf32>
    %cst_52 = arith.constant dense<0.000000e+00> : vector<16x256xf32>
    %117 = tpu.matmul %112, %116, %cst_52 {dimension_numbers = #tpu.dot_dimension_numbers<[1], [0], [0], [1], [0, 0, 1, 1], [], []>} : vector<16x16xf32>, vector<16x256xf32>, vector<16x256xf32> -> vector<16x256xf32>
    %118 = arith.addf %110, %117 : vector<16x256xf32>
    %c6_53 = arith.constant 6 : index
    %c0_54 = arith.constant 0 : index
    %c0_55 = arith.constant 0 : index
    %119 = vector.load %arg5[%c6_53, %c0_54, %c0_55] : memref<9x16x16xf32, #tpu.memory_space<vmem>>, vector<1x16x16xf32>
    %120 = vector.shape_cast %119 : vector<1x16x16xf32> to vector<16x16xf32>
    %c241_i32_56 = arith.constant 241 : i32
    %121 = tpu.dynamic_rotate %75 by %c241_i32_56 dim 1 : vector<16x256xf32>, i32 -> vector<16x256xf32>
    %c6_57 = arith.constant 6 : index
    %c0_58 = arith.constant 0 : index
    %122 = vector.load %arg1[%c6_57, %c0_58] : memref<9x256xf32, #tpu.memory_space<vmem>>, vector<1x256xf32>
    %123 = vector.broadcast %122 : vector<1x256xf32> to vector<16x256xf32>
    %124 = arith.mulf %123, %121 : vector<16x256xf32>
    %cst_59 = arith.constant dense<0.000000e+00> : vector<16x256xf32>
    %125 = tpu.matmul %120, %124, %cst_59 {dimension_numbers = #tpu.dot_dimension_numbers<[1], [0], [0], [1], [0, 0, 1, 1], [], []>} : vector<16x16xf32>, vector<16x256xf32>, vector<16x256xf32> -> vector<16x256xf32>
    %126 = arith.addf %118, %125 : vector<16x256xf32>
    %c7_60 = arith.constant 7 : index
    %c0_61 = arith.constant 0 : index
    %c0_62 = arith.constant 0 : index
    %127 = vector.load %arg5[%c7_60, %c0_61, %c0_62] : memref<9x16x16xf32, #tpu.memory_space<vmem>>, vector<1x16x16xf32>
    %128 = vector.shape_cast %127 : vector<1x16x16xf32> to vector<16x16xf32>
    %c240_i32_63 = arith.constant 240 : i32
    %129 = tpu.dynamic_rotate %75 by %c240_i32_63 dim 1 : vector<16x256xf32>, i32 -> vector<16x256xf32>
    %c7_64 = arith.constant 7 : index
    %c0_65 = arith.constant 0 : index
    %130 = vector.load %arg1[%c7_64, %c0_65] : memref<9x256xf32, #tpu.memory_space<vmem>>, vector<1x256xf32>
    %131 = vector.broadcast %130 : vector<1x256xf32> to vector<16x256xf32>
    %132 = arith.mulf %131, %129 : vector<16x256xf32>
    %cst_66 = arith.constant dense<0.000000e+00> : vector<16x256xf32>
    %133 = tpu.matmul %128, %132, %cst_66 {dimension_numbers = #tpu.dot_dimension_numbers<[1], [0], [0], [1], [0, 0, 1, 1], [], []>} : vector<16x16xf32>, vector<16x256xf32>, vector<16x256xf32> -> vector<16x256xf32>
    %134 = arith.addf %126, %133 : vector<16x256xf32>
    %c8_67 = arith.constant 8 : index
    %c0_68 = arith.constant 0 : index
    %c0_69 = arith.constant 0 : index
    %135 = vector.load %arg5[%c8_67, %c0_68, %c0_69] : memref<9x16x16xf32, #tpu.memory_space<vmem>>, vector<1x16x16xf32>
    %136 = vector.shape_cast %135 : vector<1x16x16xf32> to vector<16x16xf32>
    %c239_i32_70 = arith.constant 239 : i32
    %137 = tpu.dynamic_rotate %75 by %c239_i32_70 dim 1 : vector<16x256xf32>, i32 -> vector<16x256xf32>
    %c8_71 = arith.constant 8 : index
    %c0_72 = arith.constant 0 : index
    %138 = vector.load %arg1[%c8_71, %c0_72] : memref<9x256xf32, #tpu.memory_space<vmem>>, vector<1x256xf32>
    %139 = vector.broadcast %138 : vector<1x256xf32> to vector<16x256xf32>
    %140 = arith.mulf %139, %137 : vector<16x256xf32>
    %cst_73 = arith.constant dense<0.000000e+00> : vector<16x256xf32>
    %141 = tpu.matmul %136, %140, %cst_73 {dimension_numbers = #tpu.dot_dimension_numbers<[1], [0], [0], [1], [0, 0, 1, 1], [], []>} : vector<16x16xf32>, vector<16x256xf32>, vector<16x256xf32> -> vector<16x256xf32>
    %142 = arith.addf %134, %141 : vector<16x256xf32>
    %c0_74 = arith.constant 0 : index
    %c0_75 = arith.constant 0 : index
    %143 = vector.load %arg6[%c0_74, %c0_75] : memref<16x1xf32, #tpu.memory_space<vmem>>, vector<16x1xf32>
    %144 = vector.broadcast %143 : vector<16x1xf32> to vector<16x256xf32>
    %145 = arith.addf %142, %144 : vector<16x256xf32>
    %cst_76 = arith.constant 0.000000e+00 : f32
    %146 = vector.broadcast %cst_76 : f32 to vector<16x256xf32>
    %147 = arith.maximumf %145, %146 : vector<16x256xf32>
    %c0_77 = arith.constant 0 : index
    %c0_78 = arith.constant 0 : index
    %148 = vector.load %arg7[%c0_77, %c0_78] : memref<9x16xf32, #tpu.memory_space<vmem>>, vector<9x16xf32>
    %cst_79 = arith.constant dense<0.000000e+00> : vector<9x256xf32>
    %149 = tpu.matmul %148, %147, %cst_79 {dimension_numbers = #tpu.dot_dimension_numbers<[1], [0], [0], [1], [0, 0, 1, 1], [], []>} : vector<9x16xf32>, vector<16x256xf32>, vector<9x256xf32> -> vector<9x256xf32>
    %150 = vector.extract_strided_slice %149 {offsets = [0, 0], sizes = [1, 256], strides = [1, 1]} : vector<9x256xf32> to vector<1x256xf32>
    %c17_i32_80 = arith.constant 17 : i32
    %151 = tpu.dynamic_rotate %150 by %c17_i32_80 dim 1 : vector<1x256xf32>, i32 -> vector<1x256xf32>
    %c0_81 = arith.constant 0 : index
    %c0_82 = arith.constant 0 : index
    %152 = vector.load %arg1[%c0_81, %c0_82] : memref<9x256xf32, #tpu.memory_space<vmem>>, vector<1x256xf32>
    %153 = arith.mulf %152, %151 : vector<1x256xf32>
    %154 = vector.extract_strided_slice %149 {offsets = [1, 0], sizes = [1, 256], strides = [1, 1]} : vector<9x256xf32> to vector<1x256xf32>
    %c16_i32_83 = arith.constant 16 : i32
    %155 = tpu.dynamic_rotate %154 by %c16_i32_83 dim 1 : vector<1x256xf32>, i32 -> vector<1x256xf32>
    %c1_84 = arith.constant 1 : index
    %c0_85 = arith.constant 0 : index
    %156 = vector.load %arg1[%c1_84, %c0_85] : memref<9x256xf32, #tpu.memory_space<vmem>>, vector<1x256xf32>
    %157 = arith.mulf %156, %155 : vector<1x256xf32>
    %158 = arith.addf %153, %157 : vector<1x256xf32>
    %159 = vector.extract_strided_slice %149 {offsets = [2, 0], sizes = [1, 256], strides = [1, 1]} : vector<9x256xf32> to vector<1x256xf32>
    %c15_i32_86 = arith.constant 15 : i32
    %160 = tpu.dynamic_rotate %159 by %c15_i32_86 dim 1 : vector<1x256xf32>, i32 -> vector<1x256xf32>
    %c2_87 = arith.constant 2 : index
    %c0_88 = arith.constant 0 : index
    %161 = vector.load %arg1[%c2_87, %c0_88] : memref<9x256xf32, #tpu.memory_space<vmem>>, vector<1x256xf32>
    %162 = arith.mulf %161, %160 : vector<1x256xf32>
    %163 = arith.addf %158, %162 : vector<1x256xf32>
    %164 = vector.extract_strided_slice %149 {offsets = [3, 0], sizes = [1, 256], strides = [1, 1]} : vector<9x256xf32> to vector<1x256xf32>
    %c1_i32_89 = arith.constant 1 : i32
    %165 = tpu.dynamic_rotate %164 by %c1_i32_89 dim 1 : vector<1x256xf32>, i32 -> vector<1x256xf32>
    %c3_90 = arith.constant 3 : index
    %c0_91 = arith.constant 0 : index
    %166 = vector.load %arg1[%c3_90, %c0_91] : memref<9x256xf32, #tpu.memory_space<vmem>>, vector<1x256xf32>
    %167 = arith.mulf %166, %165 : vector<1x256xf32>
    %168 = arith.addf %163, %167 : vector<1x256xf32>
    %169 = vector.extract_strided_slice %149 {offsets = [4, 0], sizes = [1, 256], strides = [1, 1]} : vector<9x256xf32> to vector<1x256xf32>
    %170 = arith.addf %168, %169 : vector<1x256xf32>
    %171 = vector.extract_strided_slice %149 {offsets = [5, 0], sizes = [1, 256], strides = [1, 1]} : vector<9x256xf32> to vector<1x256xf32>
    %c255_i32_92 = arith.constant 255 : i32
    %172 = tpu.dynamic_rotate %171 by %c255_i32_92 dim 1 : vector<1x256xf32>, i32 -> vector<1x256xf32>
    %c5_93 = arith.constant 5 : index
    %c0_94 = arith.constant 0 : index
    %173 = vector.load %arg1[%c5_93, %c0_94] : memref<9x256xf32, #tpu.memory_space<vmem>>, vector<1x256xf32>
    %174 = arith.mulf %173, %172 : vector<1x256xf32>
    %175 = arith.addf %170, %174 : vector<1x256xf32>
    %176 = vector.extract_strided_slice %149 {offsets = [6, 0], sizes = [1, 256], strides = [1, 1]} : vector<9x256xf32> to vector<1x256xf32>
    %c241_i32_95 = arith.constant 241 : i32
    %177 = tpu.dynamic_rotate %176 by %c241_i32_95 dim 1 : vector<1x256xf32>, i32 -> vector<1x256xf32>
    %c6_96 = arith.constant 6 : index
    %c0_97 = arith.constant 0 : index
    %178 = vector.load %arg1[%c6_96, %c0_97] : memref<9x256xf32, #tpu.memory_space<vmem>>, vector<1x256xf32>
    %179 = arith.mulf %178, %177 : vector<1x256xf32>
    %180 = arith.addf %175, %179 : vector<1x256xf32>
    %181 = vector.extract_strided_slice %149 {offsets = [7, 0], sizes = [1, 256], strides = [1, 1]} : vector<9x256xf32> to vector<1x256xf32>
    %c240_i32_98 = arith.constant 240 : i32
    %182 = tpu.dynamic_rotate %181 by %c240_i32_98 dim 1 : vector<1x256xf32>, i32 -> vector<1x256xf32>
    %c7_99 = arith.constant 7 : index
    %c0_100 = arith.constant 0 : index
    %183 = vector.load %arg1[%c7_99, %c0_100] : memref<9x256xf32, #tpu.memory_space<vmem>>, vector<1x256xf32>
    %184 = arith.mulf %183, %182 : vector<1x256xf32>
    %185 = arith.addf %180, %184 : vector<1x256xf32>
    %186 = vector.extract_strided_slice %149 {offsets = [8, 0], sizes = [1, 256], strides = [1, 1]} : vector<9x256xf32> to vector<1x256xf32>
    %c239_i32_101 = arith.constant 239 : i32
    %187 = tpu.dynamic_rotate %186 by %c239_i32_101 dim 1 : vector<1x256xf32>, i32 -> vector<1x256xf32>
    %c8_102 = arith.constant 8 : index
    %c0_103 = arith.constant 0 : index
    %188 = vector.load %arg1[%c8_102, %c0_103] : memref<9x256xf32, #tpu.memory_space<vmem>>, vector<1x256xf32>
    %189 = arith.mulf %188, %187 : vector<1x256xf32>
    %190 = arith.addf %185, %189 : vector<1x256xf32>
    %c0_104 = arith.constant 0 : index
    %c0_105 = arith.constant 0 : index
    %191 = vector.load %arg8[%c0_104, %c0_105] : memref<1x1xf32, #tpu.memory_space<vmem>>, vector<1x1xf32>
    %192 = vector.broadcast %191 : vector<1x1xf32> to vector<1x256xf32>
    %193 = arith.addf %190, %192 : vector<1x256xf32>
    %194 = math.tanh %193 : vector<1x256xf32>
    %cst_106 = arith.constant -5.000000e-01 : f32
    %cst_107 = arith.constant 5.000000e-01 : f32
    %195 = vector.broadcast %cst_106 : f32 to vector<1x256xf32>
    %196 = arith.maximumf %195, %194 : vector<1x256xf32>
    %197 = vector.broadcast %cst_107 : f32 to vector<1x256xf32>
    %198 = arith.minimumf %197, %196 : vector<1x256xf32>
    %c0_108 = arith.constant 0 : index
    %c0_109 = arith.constant 0 : index
    %c0_110 = arith.constant 0 : index
    %199 = vector.load %arg9[%c0_108, %c0_109, %c0_110] : memref<1x1x256xf32, #tpu.memory_space<vmem>>, vector<1x1x256xf32>
    %200 = vector.shape_cast %199 : vector<1x1x256xf32> to vector<1x256xf32>
    %201 = vector.shape_cast %198 : vector<1x256xf32> to vector<1x1x256xf32>
    tpu.vector_store %arg9[%c0_108, %c0_109, %c0_110], %201 {strides = array<i32>} : memref<1x1x256xf32, #tpu.memory_space<vmem>>, vector<1x1x256xf32>,
    return
  }
  func.func @transform_0(%arg0: i32) -> (i32, i32) {
    %c0_i32 = arith.constant 0 : i32
    %c0_i32_0 = arith.constant 0 : i32
    %c0_i32_1 = arith.constant 0 : i32
    return %c0_i32, %c0_i32_0 : i32, i32
  }
  func.func @transform_1(%arg0: i32) -> (i32, i32, i32) {
    %c0_i32 = arith.constant 0 : i32
    %c0_i32_0 = arith.constant 0 : i32
    %c0_i32_1 = arith.constant 0 : i32
    return %arg0, %c0_i32, %c0_i32_0 : i32, i32, i32
  }
  func.func @transform_2(%arg0: i32) -> (i32, i32) {
    %c0_i32 = arith.constant 0 : i32
    %c0_i32_0 = arith.constant 0 : i32
    %c0_i32_1 = arith.constant 0 : i32
    return %c0_i32, %c0_i32_0 : i32, i32
  }
  func.func @transform_3(%arg0: i32) -> (i32, i32) {
    %c0_i32 = arith.constant 0 : i32
    %c0_i32_0 = arith.constant 0 : i32
    %c0_i32_1 = arith.constant 0 : i32
    return %c0_i32, %c0_i32_0 : i32, i32
  }
  func.func @transform_4(%arg0: i32) -> (i32, i32, i32) {
    %c0_i32 = arith.constant 0 : i32
    %c0_i32_0 = arith.constant 0 : i32
    %c0_i32_1 = arith.constant 0 : i32
    %c0_i32_2 = arith.constant 0 : i32
    return %c0_i32, %c0_i32_0, %c0_i32_1 : i32, i32, i32
  }
  func.func @transform_5(%arg0: i32) -> (i32, i32) {
    %c0_i32 = arith.constant 0 : i32
    %c0_i32_0 = arith.constant 0 : i32
    %c0_i32_1 = arith.constant 0 : i32
    return %c0_i32, %c0_i32_0 : i32, i32
  }
  func.func @transform_6(%arg0: i32) -> (i32, i32) {
    %c0_i32 = arith.constant 0 : i32
    %c0_i32_0 = arith.constant 0 : i32
    %c0_i32_1 = arith.constant 0 : i32
    return %c0_i32, %c0_i32_0 : i32, i32
  }
  func.func @transform_7(%arg0: i32) -> (i32, i32) {
    %c0_i32 = arith.constant 0 : i32
    %c0_i32_0 = arith.constant 0 : i32
    %c0_i32_1 = arith.constant 0 : i32
    return %c0_i32, %c0_i32_0 : i32, i32
  }
  func.func @transform_8(%arg0: i32) -> (i32, i32, i32) {
    %c0_i32 = arith.constant 0 : i32
    %c0_i32_0 = arith.constant 0 : i32
    %c0_i32_1 = arith.constant 0 : i32
    return %arg0, %c0_i32, %c0_i32_0 : i32, i32, i32
  }
}

</mosaic_0001>

<bundles_post_ra>
// kernel: tpu_custom_call.1
= control target key start
LH: loop header
LB: loop body
LE: loop exit
PB: predicated region body
PF: predicated region fallthrough
CT: control target
= control target key end

     0   :  { %s3545_s0 = inlined_call_operand.vmem [shape: f32[9,256], index: 0, kind: input, shape index: {}]   ;;  %s3546_s1 = inlined_call_operand.hbm [shape: f32[2,1,256], index: 1, kind: input, shape index: {}]   ;;  %s3547_s2 = inlined_call_operand.hbm [shape: f32[16,9], index: 2, kind: input, shape index: {}]   ;;  %s3548_s3 = inlined_call_operand.vmem [shape: f32[16,1], index: 3, kind: input, shape index: {}]   ;;  %s3549_s4 = inlined_call_operand.hbm [shape: f32[9,16,16], index: 4, kind: input, shape index: {}]   ;;  %s3550_s5 = inlined_call_operand.vmem [shape: f32[16,1], index: 5, kind: input, shape index: {}]   ;;  %s3551_s6 = inlined_call_operand.vmem [shape: f32[9,16], index: 6, kind: input, shape index: {}]   ;;  %s3552_s7 = inlined_call_operand.<no memory space> [shape: f32[1,1], index: 7, kind: input, shape index: {}]   ;;  %s3553_s8 = inlined_call_operand.hbm [shape: f32[2,1,256], index: 8, kind: output, shape index: {}]  }
   0x1   :  { %v13_v0 = vstv %s3552_s7 }
   0x2   :  { %14 = vst [vmem:[#allocation2] sm:$0x1] %v13_v0 }
   0x3   :  { %15 = vsyncpa [#allocation4], 0 }
   0x4   :  { %17 = vsyncpa [#allocation4 + $0x1], 0 }
   0x5   :  { %18 = vsyncpa [#allocation7], 0 }
   0x6   :  { %19 = vsyncpa [#allocation5], 0 }
   0x7   :  { %21 = vsyncpa [#allocation5 + $0x1], 0  ;;  %s2798_s29 = smov 0   ;;  %s2800_s30 = smov 0  }
   0x8   :  { %s2802_s9 = smov 0   ;;  %s2804_s10 = smov 0  }
   0x9 LB: > { %s2819_s7 = sadd.s32 4294967295, %s2723_s10   ;;  %s2338_s11 = sadd.s32 4294967294, %s2723_s10   ;;  %s2723_s10 = sphi %s2804_s10, %s3573_s10   ;;  %s2719_s9 = sphi %s2802_s9, %s3572_s9   ;;  %s2715_s30 = sphi %s2800_s30, %s3571_s30   ;;  %s2711_s29 = sphi %s2798_s29, %s3570_s29  }
   0xa   : > { %p68_p0 = scmp.ne.s32.totalorder %s2715_s30, %s2711_s29  ;;  %p3554_p1 = scmp.eq.s32.totalorder %s2819_s7, 0 }
   0xb   : > { %p224_p3 = scmp.eq.s32.totalorder %s2338_s11, 1  ;;  %p2339_p5 = scmp.ge.s32.totalorder %s2723_s10, 1 }
   0xc   : > { %p2828_p4 = por %p3554_p1, %p68_p0  ;;  %p231_p7 = scmp.lt.s32.totalorder %s2723_s10, 3 }
   0xd   : > { %p2833_p6 = por %p224_p3, %p68_p0  ;;  %s2725_s15 = smov [#allocation6]  }
   0xe   : > { %s3557_s12 = scalar_select %p2828_p4, 1, 0 }
   0xf   : > { %s3558_s13 = scalar_select %p2833_p6, 1, 0 }
  0x10   : > { %p2838_p8 = pnand %p2339_p5, %p231_p7  ;;  %s246_s16 = sshll.u32 %s2725_s15, 4  ;;  %s2842_s16 = int_to_ptr.vmem [resolvable:$true] %s246_s16 }
  0x11   : > { %s2726_s18 = smov [#allocation8]   ;;  %s2567_s22 = scalar_lea.hbm %s3547_s2, 256 }
  0x12   : > { %p2470_p9 = pneg %p2838_p8  ;;  %s262_s19 = sshll.u32 %s2726_s18, 4  ;;  %s2853_s19 = int_to_ptr.vmem [resolvable:$true] %s262_s19 }
  0x13   : > { %p2568_p12 = scmp.ne.s32.totalorder %s3547_s2, %s2567_s22  ;;  %p2574_p5 = scmp.lt.u32.totalorder %s2567_s22, %s3547_s2 }
  0x14   : > { %p2849_p11 = pnand %p2470_p9, %p3554_p1 }
  0x16   : > { %p2569_p13 = pneg %p2849_p11 }
  0x18   : > { %p2570_p0 = pnand %p2569_p13, %p2568_p12 }
  0x1a   : > { %p2571_p3 = pneg %p2570_p0 }
  0x1c   : > { %p2576_p7 = pnand %p2574_p5, %p2571_p3 }
  0x1e   : > { %2579 = shalt.err (!%p2576_p7)
}
  0x1f   : > { %s2580_s27 = scalar_lea.vmem %s2842_s16, 256  ;;  %p2588_p2 = scmp.lt.s32.totalorder %s2842_s16, %s2842_s16 }
  0x20   : > { %p2581_p9 = scmp.ne.s32.totalorder %s2842_s16, %s2580_s27  ;;  %p2589_p12 = scmp.lt.s32.totalorder %s2580_s27, %s2580_s27 }
  0x22   : > { %p2583_p10 = pnand %p2581_p9, %p2569_p13  ;;  %p2590_p0 = por %p2589_p12, %p2588_p2 }
  0x24   : > { %p2584_p1 = pneg %p2583_p10 }
  0x26   : > { %p2591_p6 = pnand %p2590_p0, %p2584_p1 }
  0x28   : > { %2594 = shalt.err (!%p2591_p6)
}
  0x29   : > { %s2727_s28 = smov 128   ;;  %s2728_s11 = smov 8  }
  0x2a   : > { %2473 = dma.hbm_to_vmem [thread:$0]  (!%p2849_p11), %s3547_s2, 256, %s2842_s16, [#allocation7], %s2727_s28, %s2727_s28, %s2728_s11  }
  0x2b   : > { %s2595_s22 = scalar_lea.hbm %s3549_s4, 2304 }
  0x2c   : > { %p2596_p2 = scmp.ne.s32.totalorder %s3549_s4, %s2595_s22  ;;  %p2602_p10 = scmp.lt.u32.totalorder %s2595_s22, %s3549_s4 }
  0x2e   : > { %p2598_p1 = pnand %p2596_p2, %p2569_p13 }
  0x30   : > { %p2599_p6 = pneg %p2598_p1 }
  0x32   : > { %p2604_p3 = pnand %p2602_p10, %p2599_p6 }
  0x34   : > { %2607 = shalt.err (!%p2604_p3)
}
  0x35   : > { %s2608_s16 = scalar_lea.vmem %s2853_s19, 2304  ;;  %p2616_p12 = scmp.lt.s32.totalorder %s2853_s19, %s2853_s19 }
  0x36   : > { %p2609_p5 = scmp.ne.s32.totalorder %s2853_s19, %s2608_s16  ;;  %p2617_p0 = scmp.lt.s32.totalorder %s2608_s16, %s2608_s16 }
  0x38   : > { %p2611_p7 = pnand %p2609_p5, %p2569_p13  ;;  %p2618_p2 = por %p2617_p0, %p2616_p12 }
  0x3a   : > { %p2612_p9 = pneg %p2611_p7 }
  0x3c   : > { %p2619_p1 = pnand %p2618_p2, %p2612_p9 }
  0x3e   : > { %2622 = shalt.err (!%p2619_p1)
}
  0x3f   : > { %2476 = dma.hbm_to_vmem [thread:$0]  (!%p2849_p11), %s3549_s4, 2304, %s2853_s19, [#allocation7], %s2727_s28, %s2727_s28, %s2728_s11  }
  0x40   : > { %s2908_s18 = sadd.s32 1, %s2723_s10   ;;  %s55_s17 = sadd.s32 1, %s2719_s9 }
  0x41   : > { %s52_s20 = ssub.s32 %s2723_s10, %s2908_s18  ;;  %p62_p13 = scmp.ne.s32.totalorder %s2719_s9, %s2715_s30 }
  0x42   : > { %p53_p6 = scmp.eq.s32.totalorder %s52_s20, 0  ;;  %p63_p10 = scmp.eq.s32.totalorder %s2723_s10, 0 }
  0x43   : > { %p3561_p3 = scmp.eq.s32.totalorder %s2819_s7, 1  ;;  %p2487_p7 = scmp.lt.s32.totalorder %s2723_s10, 2 }
  0x44   : > { %s2924_s22 = scalar_select %p53_p6, %s2719_s9, %s55_s17  }
  0x45   : > { %p2918_p5 = por %p3561_p3, %p62_p13  ;;  %p64_p9 = por %p63_p10, %p62_p13 }
  0x46   : > { %s285_s23 = sand.u32 1, %s2719_s9   ;;  %s2384_s19 = sshll.u32 %s2723_s10, 5 }
  0x47   : > { %s3562_s21 = scalar_select %p2918_p5, 1, 0 }
  0x48   : > { %s2343_s24 = sshll.u32 %s285_s23, 1  ;;  %s2931_s25 = scalar_lea.hbm %s3546_s1, %s2384_s19 }
  0x49   : > { %s289_s26 = scalar_lea.vmem [#allocation3], %s2343_s24  ;;  %p2935_p11 = pnand %p2487_p7, %p64_p9 }
  0x4a   : > { %s297_s16 = sshll.u32 %s289_s26, 4  ;;  %s286_s15 = scalar_lea.sflag [#allocation4], %s285_s23  ;;  %s2933_s16 = int_to_ptr.vmem [resolvable:$true] %s297_s16 }
  0x4b   : > { %s2623_s17 = scalar_lea.hbm %s2931_s25, 32  ;;  %p2625_p0 = pneg %p2935_p11 }
  0x4c   : > { %p2624_p12 = scmp.ne.s32.totalorder %s2931_s25, %s2623_s17  ;;  %s2628_s19 = scalar_lea.hbm %s3546_s1, 64 }
  0x4d   : > { %p2629_p13 = scmp.lt.u32.totalorder %s2931_s25, %s3546_s1  ;;  %p2630_p6 = scmp.lt.u32.totalorder %s2628_s19, %s2623_s17 }
  0x4e   : > { %p2626_p2 = pnand %p2625_p0, %p2624_p12  ;;  %p2632_p3 = scmp.lt.u32.totalorder %s2623_s17, %s2931_s25 }
  0x4f   : > { %p2631_p10 = por %p2630_p6, %p2629_p13 }
  0x50   : > { %p2627_p1 = pneg %p2626_p2 }
  0x51   : > { %p2633_p7 = por %p2632_p3, %p2631_p10 }
  0x53   : > { %p2634_p9 = pnand %p2633_p7, %p2627_p1 }
  0x55   : > { %2637 = shalt.err (!%p2634_p9)
}
  0x56   : > { %s2638_s23 = scalar_lea.vmem %s2933_s16, 32  ;;  %s2729_s26 = smov [#allocation3]  }
  0x57   : > { %p2639_p12 = scmp.ne.s32.totalorder %s2933_s16, %s2638_s23  ;;  %s2643_s20 = sshll.u32 %s2729_s26, 4  ;;  %s2644_s20 = int_to_ptr.vmem [resolvable:$false] %s2643_s20 }
  0x58   : > { %s2645_s24 = scalar_lea.vmem %s2644_s20, 64  ;;  %p2646_p4 = scmp.lt.s32.totalorder %s2933_s16, %s2644_s20 }
  0x59   : > { %p2641_p2 = pnand %p2639_p12, %p2625_p0  ;;  %p2647_p13 = scmp.lt.s32.totalorder %s2645_s24, %s2638_s23 }
  0x5b   : > { %p2642_p5 = pneg %p2641_p2  ;;  %p2648_p6 = por %p2647_p13, %p2646_p4 }
  0x5d   : > { %p2649_p10 = pnand %p2648_p6, %p2642_p5 }
  0x5f   : > { %2652 = shalt.err (!%p2649_p10)
}
  0x60   : > { %2480 = dma.hbm_to_vmem [thread:$0]  (!%p2935_p11), %s2931_s25, 32, %s2933_s16, %s286_s15  }
  0x61   : > { %306 = sbr.rel (%p2838_p8) target bundleno = 1152 (0x480), region = 52  ;;  %s2967_s17 = sand.u32 (!%p2838_p8), 1, %s2715_s30  }
  0x62   : > { %s2347_s19 = sshll.u32 (!%p2838_p8), %s2967_s17, 1  ;;  %s309_s28 = scalar_lea.sflag (!%p2838_p8), [#allocation4], %s2967_s17 }
  0x63   : > { %s312_s11 = scalar_lea.vmem (!%p2838_p8), [#allocation3], %s2347_s19  ;;  %p3564_p4 = scmp.ne.s32.totalorder (!%p2838_p8), %s3557_s12, 0 }
  0x68   : > { %2698 = dma.done.wait (%p3564_p4), %s309_s28, 32  }
  0x69   : > { %2700 = vsyncadd (%p3564_p4), %s309_s28, 4294967264  ;;  %p3565_p5 = scmp.eq.s32.totalorder %s2819_s7, 0 }
  0x6b   : > { %2702 = dma.done.wait (%p3565_p5), [#allocation7], 2560   ;;  %p3566_p8 = pmov %p3565_p5 }
  0x6c   : > { %v357_v1 = vlaneseq  ;;  %v2730_v3 = vmov 0   ;;  %v353_v6 = vld [vmem:[%s312_s11] sm:$0x3]  ;;  %s2731_s12 = smov 16   ;;  %s2732_s14 = smov 17   ;;  %v355_v9 = vld [vmem:[#allocation6 + $0x8] sm:$0xff] }
  0x6d   : > { %2704 = vsyncadd (%p3566_p8), [#allocation7], 4294964736  ;;  %2547 = vset.pattern.permute.xlu1 %v2730_v3  ;;  %2546 = vset.pattern.permute.xlu0 %v2730_v3  ;;  %s2733_s25 = smov 15   ;;  %v354_v10 = vld [vmem:[#allocation6] sm:$0xff]  ;;  %v2734_v11 = vmov 1   ;;  %s2735_s16 = smov 1  }
  0x6e   : > { %v2982_v2 = vshrl.u32 %v357_v1, 7  ;;  %v2736_v12 = vmov 2   ;;  %v2737_v13 = vmov 3   ;;  %v2738_v14 = vmov 4   ;;  %s2739_s27 = smov 113   ;;  %s2741_s15 = smov 127  }
  0x6f   : > { %v2740_v15 = vmov 5   ;;  %v2742_v16 = vmov 6   ;;  %s2743_s23 = smov 111   ;;  %v2744_v17 = vmov 7   ;;  %v822_v18 = vld [vmem:[%s3548_s3] sm:$0xff]  ;;  %s2745_s24 = smov 112  }
  0x70   : > { %v2987_v4 = vsub.s32 0, %v2982_v2  ;;  %v2990_v5 = vsub.s32 1, %v2982_v2  ;;  %v2746_v19 = vmov 8   ;;  %v823_v20 = vld [vmem:[%s3548_s3 + $0x8] sm:$0xff]  ;;  %v3047_v33 = vand.u32 127, %v357_v1  ;;  %p3567_p0 = scmp.ne.s32.totalorder %s3562_s21, 0 }
  0x71   : > { %v2747_v35 = vmov 1966171168   ;;  %v3092_v62 = vld [vmem:[%s3545_s0] ss:$8 sm:$0x3]  ;;  %vm901_vm8 = vcmask 130048  }
  0x72   : > { %v2993_v7 = vrot.slane %v353_v6, %v2987_v4  ;;  %v3000_v8 = vrot.slane %v353_v6, %v2990_v5  ;;  %v381_v36 = vunpack.c.l.s4 %v2747_v35  ;;  %vm373_vm0 = vcmp.lt.s32.totalorder %v3047_v33, 17 }
  0x73   : > { %vm425_vm1 = vcmp.lt.s32.totalorder %v3047_v33, 16  ;;  %vm480_vm2 = vcmp.lt.s32.totalorder %v3047_v33, 15  ;;  %vm535_vm3 = vcmp.lt.s32.totalorder %v3047_v33, 1  ;;  %vm606_vm4 = vcmp.lt.s32.totalorder %v3047_v33, 127 }
  0x74   : > { %421 = vrot.lane.b32.xlu1 %v2993_v7, %s2731_s12  ;;  %367 = vrot.lane.b32.xlu0 %v2993_v7, %s2732_s14  ;;  %v382_v40 = vunpack.c.0.s8 %v381_v36  ;;  %vm661_vm5 = vcmp.lt.s32.totalorder %v3047_v33, 113  ;;  %vm716_vm6 = vcmp.lt.s32.totalorder %v3047_v33, 112  ;;  %vm771_vm7 = vcmp.lt.s32.totalorder %v3047_v33, 111 }
  0x75   : > { %vm2231_vm9 = vcmp.lt.s32.totalorder %v357_v1, 256 }
  0x76   : > { %v3072_v48 = vsub.s32 %v382_v40, %v2982_v2 }
  0x78   : > { %423 = vrot.lane.b32.xlu1 %v3000_v8, %s2731_s12  ;;  %369 = vrot.lane.b32.xlu0 %v3000_v8, %s2732_s14 }
  0x7c   : > { %478 = vrot.lane.b32.xlu1 %v3000_v8, %s2733_s25  ;;  %476 = vrot.lane.b32.xlu0 %v2993_v7, %s2733_s25 }
  0x80   : > { %403 = vperm.xlu1 %2547, %v355_v9   ;;  %398 = vperm.xlu0 %2546, %v354_v10  }
  0x84   : > { %2548 = vset.pattern.permute.xlu1 %v2734_v11  ;;  %2549 = vset.pattern.permute.xlu0 %v2734_v11  ;;  %v3106_v11 = vld [vmem:[%s3545_s0 + $0x1] ss:$8 sm:$0x3] }
  0x85   : > { %450 = vperm.xlu1 %2548, %v354_v10   ;;  %454 = vperm.xlu0 %2549, %v355_v9  }
  0x89   : > { %531 = vrot.lane.b32.xlu1 %v2993_v7, %s2735_s16  ;;  %2550 = vset.pattern.permute.xlu0 %v2736_v12 }
  0x8a   : > { %505 = vperm.xlu0 %2550, %v354_v10   ;;  %2551 = vset.pattern.permute.xlu1 %v2736_v12 }
  0x8d   : > { %533 = vrot.lane.b32.xlu1 %v3000_v8, %s2735_s16 }
  0x8e   : > { %2553 = vset.pattern.permute.xlu0 %v2737_v13 }
  0x8f   : > { %564 = vperm.xlu0 %2553, %v355_v9  }
  0x91   : > { %509 = vperm.xlu1 %2551, %v355_v9  }
  0x93   : > { %2554 = vset.pattern.permute.xlu0 %v2738_v14 }
  0x94   : > { %587 = vperm.xlu0 %2554, %v354_v10  }
  0x95   : > { %2552 = vset.pattern.permute.xlu1 %v2737_v13  ;;  %v3111_v13 = vld [vmem:[%s3545_s0 + $0x2] ss:$8 sm:$0x3] }
  0x96   : > { %560 = vperm.xlu1 %2552, %v354_v10  }
  0x98   : > { %659 = vrot.lane.b32.xlu0 %v3000_v8, %s2739_s27 }
  0x99   : > { %2557 = vset.pattern.permute.xlu0 %v2740_v15 }
  0x9a   : > { %602 = vrot.lane.b32.xlu1 %v2993_v7, %s2741_s15 }
  0x9b   : > { %2555 = vset.pattern.permute.xlu1 %v2738_v14 }
  0x9c   : > { %635 = vperm.xlu0 %2557, %v355_v9  }
  0x9e   : > { %604 = vrot.lane.b32.xlu1 %v3000_v8, %s2741_s15 }
  0xa0   : > { %2558 = vset.pattern.permute.xlu0 %v2742_v16 }
  0xa1   : > { %686 = vperm.xlu0 %2558, %v354_v10  }
  0xa2   : > { %591 = vperm.xlu1 %2555, %v355_v9  }
  0xa5   : > { %769 = vrot.lane.b32.xlu0 %v3000_v8, %s2743_s23 }
  0xa6   : > { %657 = vrot.lane.b32.xlu1 %v2993_v7, %s2739_s27  ;;  %2561 = vset.pattern.permute.xlu0 %v2744_v17 }
  0xa7   : > { %2556 = vset.pattern.permute.xlu1 %v2740_v15 }
  0xa9   : > { %745 = vperm.xlu0 %2561, %v355_v9  }
  0xaa   : > { %631 = vperm.xlu1 %2556, %v354_v10  }
  0xad   : > { %2563 = vset.pattern.permute.xlu0 %v2730_v3 }
  0xae   : > { %712 = vrot.lane.b32.xlu1 %v2993_v7, %s2745_s24  ;;  %826 = vperm.xlu0 %2563, %v822_v18  }
  0xaf   : > { %2559 = vset.pattern.permute.xlu1 %v2742_v16 }
  0xb2   : > { %714 = vrot.lane.b32.xlu1 %v3000_v8, %s2745_s24 }
  0xb6   : > { %690 = vperm.xlu1 %2559, %v355_v9  }
  0xba   : > { %767 = vrot.lane.b32.xlu1 %v2993_v7, %s2743_s23 }
  0xbb   : > { %2560 = vset.pattern.permute.xlu1 %v2744_v17 }
  0xbe   : > { %741 = vperm.xlu1 %2560, %v354_v10  }
  0xc2   : > { %2562 = vset.pattern.permute.xlu1 %v2746_v19 }
  0xc3   : > { %796 = vperm.xlu1 %2562, %v354_v10  }
  0xc7   : > { %800 = vperm.xlu1 %2562, %v355_v9  }
  0xcb   : > { %2564 = vset.pattern.permute.xlu1 %v2730_v3 }
  0xcc   : > { %831 = vperm.xlu1 %2564, %v823_v20  }
  0xe6   : > { %v422_v21 = vpop.permute.xlu1 %421  ;;  %v368_v24 = vpop.permute.xlu0 %367 }
  0xea   : > { %v424_v22 = vpop.permute.xlu1 %423  ;;  %v370_v26 = vpop.permute.xlu0 %369 }
  0xeb   : > { %v374_v38 = vsel %vm373_vm0, %v368_v24, %v370_v26  ;;  %v375_v39 = vsel %vm373_vm0, %v370_v26, %v368_v24  ;;  %v426_v43 = vsel %vm425_vm1, %v422_v21, %v424_v22  ;;  %v427_v44 = vsel %vm425_vm1, %v424_v22, %v422_v21  ;;  %v3126_v22 = vld [vmem:[%s3545_s0 + $0x3] ss:$8 sm:$0x3] }
  0xec   : > { %v379_v45 = vcombine.low %v375_v39, %v374_v38  ;;  %v432_v51 = vcombine.low %v427_v44, %v426_v43 }
  0xee   : > { %v479_v23 = vpop.permute.xlu1 %478  ;;  %v477_v29 = vpop.permute.xlu0 %476  ;;  %v386_v52 = vrot.slane %v379_v45, %v3072_v48  ;;  %v439_v57 = vrot.slane %v432_v51, %v3072_v48 }
  0xef   : > { %v481_v46 = vsel %vm480_vm2, %v477_v29, %v479_v23  ;;  %v482_v47 = vsel %vm480_vm2, %v479_v23, %v477_v29 }
  0xf0   : > { %v487_v53 = vcombine.low %v482_v47, %v481_v46  ;;  %v393_v59 = vrot.slane %v386_v52, %v3072_v48  ;;  %v446_v3 = vrot.slane %v439_v57, %v3072_v48 }
  0xf2   : > { %v494_v60 = vrot.slane %v487_v53, %v3072_v48  ;;  %v395_v10 = vmul.f32 %v393_v59, %v3092_v62  ;;  %v448_v18 = vmul.f32 %v3106_v11, %v446_v3  ;;  %v3151_v53 = vld [vmem:[%s3545_s0 + $0x5] ss:$8 sm:$0x3] }
  0xf4   : > { %v501_v9 = vrot.slane %v494_v60, %v3072_v48  ;;  %v410_v20 = vrot.slane %v395_v10, %v2987_v4  ;;  %v461_v29 = vrot.slane %v448_v18, %v2987_v4 }
  0xf6   : > { %v503_v21 = vmul.f32 %v3111_v13, %v501_v9  ;;  %v3168_v9 = vld [vmem:[%s3545_s0 + $0x6] ss:$8 sm:$0x3] }
  0xf8   : > { %v516_v38 = vrot.slane %v503_v21, %v2987_v4  ;;  %v520_v39 = vrot.slane %v503_v21, %v2990_v5 }
  0xff   : > { %v3038_v25 = vpop.permute.xlu1 %403  ;;  %v3042_v31 = vpop.permute.xlu0 %398 }
 0x100   : > { %v419_v36 = vmul.f32 %v410_v20, %v3038_v25  ;;  %v417_v43 = vmul.f32 %v410_v20, %v3042_v31 }
 0x104   : > { %v3040_v27 = vpop.permute.xlu1 %450  ;;  %v3049_v34 = vpop.permute.xlu0 %454 }
 0x105   : > { %v468_v45 = vmul.f32 %v461_v29, %v3040_v27 }
 0x108   : > { %v532_v28 = vpop.permute.xlu1 %531 }
 0x109   : > { %v3060_v41 = vpop.permute.xlu0 %505 }
 0x10a   : > { %v523_v52 = vmul.f32 %v516_v38, %v3060_v41 }
 0x10c   : > { %v534_v30 = vpop.permute.xlu1 %533 }
 0x10d   : > { %v536_v54 = vsel %vm535_vm3, %v532_v28, %v534_v30  ;;  %v537_v55 = vsel %vm535_vm3, %v534_v30, %v532_v28  ;;  %v414_v28 = vrot.slane %v395_v10, %v2990_v5  ;;  %v465_v30 = vrot.slane %v448_v18, %v2990_v5  ;;  %v3177_v18 = vld [vmem:[%s3545_s0 + $0x7] ss:$8 sm:$0x3] }
 0x10e   : > { %v3074_v49 = vpop.permute.xlu0 %564  ;;  %v542_v58 = vcombine.low %v537_v55, %v536_v54 }
 0x10f   : > { %v418_v44 = vmul.f32 %v414_v28, %v3042_v31  ;;  %v469_v47 = vmul.f32 %v465_v30, %v3040_v27  ;;  %v471_v51 = vmul.f32 %v465_v30, %v3049_v34 }
 0x110   : > { %v3044_v32 = vpop.permute.xlu1 %509  ;;  %v549_v6 = vrot.slane %v542_v58, %v3072_v48 }
 0x111   : > { %v525_v58 = vmul.f32 %v516_v38, %v3044_v32  ;;  %v526_v3 = vmul.f32 %v520_v39, %v3044_v32  ;;  %v473_v10 = vadd.f32 %v469_v47, %v418_v44 }
 0x112   : > { %v556_v19 = vrot.slane %v549_v6, %v3072_v48 }
 0x113   : > { %v3087_v61 = vpop.permute.xlu0 %587 }
 0x114   : > { %v558_v35 = vmul.f32 %v3126_v22, %v556_v19  ;;  %v595_v30 = vmul.f32 %v3087_v61, %v3000_v8 }
 0x115   : > { %v3052_v37 = vpop.permute.xlu1 %560 }
 0x116   : > { %v571_v31 = vrot.slane %v558_v35, %v2987_v4  ;;  %v575_v55 = vrot.slane %v558_v35, %v2990_v5 }
 0x117   : > { %v660_v12 = vpop.permute.xlu0 %659 }
 0x118   : > { %v579_v32 = vmul.f32 %v575_v55, %v3052_v37 }
 0x119   : > { %v603_v42 = vpop.permute.xlu1 %602 }
 0x11d   : > { %v605_v50 = vpop.permute.xlu1 %604 }
 0x11e   : > { %v607_v63 = vsel %vm606_vm4, %v603_v42, %v605_v50  ;;  %v608_v0 = vsel %vm606_vm4, %v605_v50, %v603_v42  ;;  %v3138_v42 = vpop.permute.xlu0 %635  ;;  %v470_v50 = vmul.f32 %v461_v29, %v3049_v34  ;;  %v524_v34 = vmul.f32 %v520_v39, %v3060_v41 }
 0x11f   : > { %v613_v14 = vcombine.low %v607_v63, %v608_v0  ;;  %v420_v0 = vmul.f32 %v414_v28, %v3038_v25  ;;  %v578_v25 = vmul.f32 %v571_v31, %v3052_v37  ;;  %v581_v28 = vmul.f32 %v575_v55, %v3074_v49 }
 0x120   : > { %v474_v41 = vadd.f32 %v470_v50, %v419_v36  ;;  %v528_v19 = vadd.f32 %v524_v34, %v473_v10  ;;  %v594_v37 = vmul.f32 %v3087_v61, %v2993_v7 }
 0x121   : > { %v3081_v56 = vpop.permute.xlu1 %591  ;;  %v620_v24 = vrot.slane %v613_v14, %v3072_v48 }
 0x122   : > { %v687_v60 = vpop.permute.xlu0 %686  ;;  %v529_v20 = vadd.f32 %v525_v58, %v474_v41 }
 0x123   : > { %v627_v46 = vrot.slane %v620_v24, %v3072_v48 }
 0x125   : > { %v658_v2 = vpop.permute.xlu1 %657  ;;  %v629_v6 = vmul.f32 %v3151_v53, %v627_v46 }
 0x126   : > { %v662_v15 = vsel %vm661_vm5, %v658_v2, %v660_v12  ;;  %v663_v16 = vsel %vm661_vm5, %v660_v12, %v658_v2  ;;  %v472_v2 = vadd.f32 %v468_v45, %v417_v43  ;;  %v770_v36 = vpop.permute.xlu0 %769  ;;  %v583_v43 = vadd.f32 %v579_v32, %v528_v19 }
 0x127   : > { %v668_v23 = vcombine.low %v662_v15, %v663_v16  ;;  %v475_v15 = vadd.f32 %v471_v51, %v420_v0  ;;  %v642_v29 = vrot.slane %v629_v6, %v2987_v4  ;;  %v646_v35 = vrot.slane %v629_v6, %v2990_v5 }
 0x128   : > { %v527_v16 = vadd.f32 %v523_v52, %v472_v2  ;;  %v596_v45 = vmul.f32 %v3081_v56, %v2993_v7  ;;  %v597_v52 = vmul.f32 %v3081_v56, %v3000_v8  ;;  %v599_v58 = vadd.f32 %v595_v30, %v583_v43  ;;  %v3210_v8 = vld [vmem:[%s3545_s0 + $0x10] ss:$8 sm:$0x3] }
 0x129   : > { %v3117_v17 = vpop.permute.xlu1 %631  ;;  %v675_v40 = vrot.slane %v668_v23, %v3072_v48  ;;  %v530_v24 = vadd.f32 %v526_v3, %v475_v15 }
 0x12a   : > { %v746_v3 = vpop.permute.xlu0 %745 }
 0x12b   : > { %v682_v59 = vrot.slane %v675_v40, %v3072_v48  ;;  %v582_v40 = vadd.f32 %v578_v25, %v527_v16  ;;  %v585_v51 = vadd.f32 %v581_v28, %v530_v24 }
 0x12d   : > { %v713_v26 = vpop.permute.xlu1 %712  ;;  %v684_v21 = vmul.f32 %v3168_v9, %v682_v59  ;;  %v598_v34 = vadd.f32 %v594_v37, %v582_v40  ;;  %v651_v59 = vmul.f32 %v642_v29, %v3138_v42  ;;  %v601_v6 = vadd.f32 %v597_v52, %v585_v51 }
 0x12e   : > { %v827_v43 = vpop.permute.xlu0 %826 }
 0x12f   : > { %v697_v46 = vrot.slane %v684_v21, %v2987_v4  ;;  %v701_v61 = vrot.slane %v684_v21, %v2990_v5 }
 0x131   : > { %v715_v54 = vpop.permute.xlu1 %714  ;;  %v705_v0 = vmul.f32 %v701_v61, %v687_v60 }
 0x132   : > { %v717_v57 = vsel %vm716_vm6, %v713_v26, %v715_v54  ;;  %v718_v27 = vsel %vm716_vm6, %v715_v54, %v713_v26  ;;  %v580_v26 = vmul.f32 %v571_v31, %v3074_v49  ;;  %v649_v54 = vmul.f32 %v642_v29, %v3117_v17 }
 0x133   : > { %v723_v63 = vcombine.low %v717_v57, %v718_v27  ;;  %v650_v31 = vmul.f32 %v646_v35, %v3117_v17  ;;  %v704_v17 = vmul.f32 %v697_v46, %v687_v60 }
 0x134   : > { %v584_v50 = vadd.f32 %v580_v26, %v529_v20  ;;  %v653_v10 = vadd.f32 %v649_v54, %v598_v34 }
 0x135   : > { %v730_v12 = vrot.slane %v723_v63, %v3072_v48  ;;  %v691_v14 = vpop.permute.xlu1 %690  ;;  %v652_v63 = vmul.f32 %v646_v35, %v3138_v42  ;;  %v654_v15 = vadd.f32 %v650_v31, %v599_v58 }
 0x136   : > { %v600_v56 = vadd.f32 %v596_v45, %v584_v50  ;;  %v706_v41 = vmul.f32 %v697_v46, %v691_v14  ;;  %v708_v24 = vadd.f32 %v704_v17, %v653_v10  ;;  %v1860_v17 = vld [vmem:[%s3550_s5] sm:$0xff]  ;;  %v890_v10 = vrot.slane %v3106_v11, %v2987_v4 }
 0x137   : > { %v737_v23 = vrot.slane %v730_v12, %v3072_v48  ;;  %v707_v12 = vmul.f32 %v701_v61, %v691_v14  ;;  %v656_v19 = vadd.f32 %v652_v63, %v601_v6  ;;  %v709_v26 = vadd.f32 %v705_v0, %v654_v15  ;;  %v1303_v63 = vld [vmem:[#allocation8 + $0x40] sm:$0xff]  ;;  %v1861_v0 = vld [vmem:[%s3550_s5 + $0x8] sm:$0xff] }
 0x138   : > { %v655_v32 = vadd.f32 %v651_v59, %v600_v56  ;;  %v2748_v59 = vmov 0.0   ;;  %v1304_v56 = vld [vmem:[#allocation8 + $0x48] sm:$0xff] }
 0x139   : > { %v768_v38 = vpop.permute.xlu1 %767  ;;  %v739_v39 = vmul.f32 %v3177_v18, %v737_v23  ;;  %v711_v37 = vadd.f32 %v707_v12, %v656_v19  ;;  %1375 = vmatprep.mubr.f32.mxu0 %v2748_v59  ;;  %972 = vmatprep.mubr.f32.mxu1 %v2748_v59 }
 0x13a   : > { %v772_v44 = vsel %vm771_vm7, %v768_v38, %v770_v36  ;;  %v773_v49 = vsel %vm771_vm7, %v770_v36, %v768_v38  ;;  %v710_v29 = vadd.f32 %v706_v41, %v655_v32  ;;  %v894_v41 = vrot.slane %v3106_v11, %v2990_v5 }
 0x13b   : > { %v778_v47 = vcombine.low %v772_v44, %v773_v49  ;;  %v752_v57 = vrot.slane %v739_v39, %v2987_v4  ;;  %v756_v7 = vrot.slane %v739_v39, %v2990_v5 }
 0x13d   : > { %v785_v55 = vrot.slane %v778_v47, %v3072_v48  ;;  %v742_v27 = vpop.permute.xlu1 %741  ;;  %v761_v20 = vmul.f32 %v752_v57, %v746_v3  ;;  %v762_v21 = vmul.f32 %v756_v7, %v746_v3 }
 0x13e   : > { %v759_v16 = vmul.f32 %v752_v57, %v742_v27  ;;  %v760_v25 = vmul.f32 %v756_v7, %v742_v27 }
 0x13f   : > { %v792_v2 = vrot.slane %v785_v55, %v3072_v48  ;;  %v765_v38 = vadd.f32 %v761_v20, %v710_v29  ;;  %v766_v39 = vadd.f32 %v762_v21, %v711_v37  ;;  %v1411_v29 = vrot.slane %v3151_v53, %v2987_v4 }
 0x140   : > { %v763_v30 = vadd.f32 %v759_v16, %v708_v24  ;;  %v764_v14 = vadd.f32 %v760_v25, %v709_v26  ;;  %v1415_v37 = vrot.slane %v3151_v53, %v2990_v5 }
 0x141   : > { %v794_v42 = vmul.f32 %v3210_v8, %v792_v2 }
 0x142   : > { %v797_v23 = vpop.permute.xlu1 %796 }
 0x143   : > { %v807_v60 = vrot.slane %v794_v42, %v2987_v4  ;;  %v811_v28 = vrot.slane %v794_v42, %v2990_v5 }
 0x145   : > { %v814_v35 = vmul.f32 %v807_v60, %v797_v23  ;;  %v815_v36 = vmul.f32 %v811_v28, %v797_v23 }
 0x146   : > { %v801_v40 = vpop.permute.xlu1 %800 }
 0x147   : > { %v816_v44 = vmul.f32 %v807_v60, %v801_v40  ;;  %v817_v49 = vmul.f32 %v811_v28, %v801_v40  ;;  %v818_v45 = vadd.f32 %v814_v35, %v763_v30  ;;  %v819_v46 = vadd.f32 %v815_v36, %v764_v14  ;;  %v872_v35 = vld [vmem:[#allocation8 + $0x10] sm:$0xff] }
 0x149   : > { %v834_v61 = vadd.f32 %v827_v43, %v818_v45  ;;  %v820_v47 = vadd.f32 %v816_v44, %v765_v38  ;;  %v821_v50 = vadd.f32 %v817_v49, %v766_v39  ;;  %v835_v51 = vadd.f32 %v827_v43, %v819_v46  ;;  %v873_v46 = vld [vmem:[#allocation8 + $0x18] sm:$0xff] }
 0x14b   : > { %v838_v52 = vmax.f32 %v834_v61, 0.0  ;;  %v832_v54 = vpop.permute.xlu1 %831  ;;  %v839_v57 = vmax.f32 %v835_v51, 0.0 }
 0x14c   : > { %v836_v31 = vadd.f32 %v832_v54, %v820_v47  ;;  %v837_v55 = vadd.f32 %v832_v54, %v821_v50  ;;  %v864_v54 = vrot.slane %v3092_v62, %v2990_v5 }
 0x14d   : > { %874 = vrot.lane.b32.xlu1 %v838_v52, %s2731_s12 }
 0x14e   : > { %v840_v7 = vmax.f32 %v836_v31, 0.0  ;;  %v841_v27 = vmax.f32 %v837_v55, 0.0 }
 0x150   : > { %876 = vrot.lane.b32.xlu0 %v840_v7, %s2731_s12  ;;  %v2402_v34 = vpack.c.bf16 %v841_v27, %v839_v57  ;;  %v2404_v58 = vpack.c.bf16 %v840_v7, %v838_v52 }
 0x151   : > { %878 = vrot.lane.b32.xlu1 %v839_v57, %s2731_s12 }
 0x152   : > { %2403 = vmatprep.subr.bf16.mxu0 %v2402_v34 }
 0x153   : > { %2405 = vmatpush1.bf16.msra.mxu0 %v2404_v58 }
 0x154   : > { %880 = vrot.lane.b32.xlu0 %v841_v27, %s2731_s12 }
 0x155   : > { %1395 = vrot.lane.b32.xlu1 %v838_v52, %s2741_s15 }
 0x156   : > { %2366 = vmatmul.mubr.msk.f32.vlgmr.msra.gmra.mrb[0].mxu0 %vm901_vm8, %v1303_v63 }
 0x157   : > { %1381 = vmatprep.mubr.f32.mxu0 %v2748_v59 }
 0x158   : > { %1397 = vrot.lane.b32.xlu0 %v840_v7, %s2741_s15 }
 0x159   : > { %1399 = vrot.lane.b32.xlu1 %v839_v57, %s2741_s15 }
 0x15a   : > { %2367 = vmatmul.mubr.msk.f32.gmra.mrb[2].mxu0 %vm901_vm8, %v1304_v56 }
 0x15b   : > { %1492 = vmatprep.mubr.f32.mxu0 %v2748_v59 }
 0x15c   : > { %1401 = vrot.lane.b32.xlu0 %v841_v27, %s2741_s15 }
 0x15d   : > { %844 = vrot.lane.b32.xlu1 %v838_v52, %s2732_s14 }
 0x160   : > { %846 = vrot.lane.b32.xlu0 %v840_v7, %s2732_s14 }
 0x161   : > { %848 = vrot.lane.b32.xlu1 %v839_v57, %s2732_s14 }
 0x164   : > { %850 = vrot.lane.b32.xlu0 %v841_v27, %s2732_s14 }
 0x165   : > { %1512 = vrot.lane.b32.xlu1 %v838_v52, %s2739_s27 }
 0x168   : > { %1514 = vrot.lane.b32.xlu0 %v840_v7, %s2739_s27 }
 0x169   : > { %1516 = vrot.lane.b32.xlu1 %v839_v57, %s2739_s27 }
 0x16c   : > { %1518 = vrot.lane.b32.xlu0 %v841_v27, %s2739_s27 }
 0x16d   : > { %1071 = vrot.lane.b32.xlu1 %v838_v52, %s2733_s25 }
 0x170   : > { %1073 = vrot.lane.b32.xlu0 %v840_v7, %s2733_s25 }
 0x171   : > { %1075 = vrot.lane.b32.xlu1 %v839_v57, %s2733_s25 }
 0x174   : > { %1077 = vrot.lane.b32.xlu0 %v841_v27, %s2733_s25 }
 0x175   : > { %1629 = vrot.lane.b32.xlu1 %v838_v52, %s2745_s24 }
 0x178   : > { %1631 = vrot.lane.b32.xlu0 %v840_v7, %s2745_s24 }
 0x179   : > { %1633 = vrot.lane.b32.xlu1 %v839_v57, %s2745_s24 }
 0x17c   : > { %1635 = vrot.lane.b32.xlu0 %v841_v27, %s2745_s24 }
 0x17d   : > { %1188 = vrot.lane.b32.xlu1 %v838_v52, %s2735_s16 }
 0x180   : > { %1190 = vrot.lane.b32.xlu0 %v840_v7, %s2735_s16 }
 0x181   : > { %1192 = vrot.lane.b32.xlu1 %v839_v57, %s2735_s16 }
 0x184   : > { %1194 = vrot.lane.b32.xlu0 %v841_v27, %s2735_s16 }
 0x185   : > { %1746 = vrot.lane.b32.xlu1 %v838_v52, %s2743_s23  ;;  %v860_v52 = vrot.slane %v3092_v62, %v2987_v4 }
 0x188   : > { %1748 = vrot.lane.b32.xlu0 %v840_v7, %s2743_s23 }
 0x189   : > { %1750 = vrot.lane.b32.xlu1 %v839_v57, %s2743_s23  ;;  %v1393_v57 = vld [vmem:[#allocation8 + $0x50] sm:$0xff] }
 0x18c   : > { %1752 = vrot.lane.b32.xlu0 %v841_v27, %s2743_s23 }
 0x18d   : > { %1864 = vperm.xlu1 %2564, %v1860_v17  }
 0x190   : > { %1869 = vperm.xlu0 %2563, %v1861_v0  }
 0x1bf   : > { %v875_v2 = vpop.permute.xlu1 %874 }
 0x1c2   : > { %v877_v3 = vpop.permute.xlu0 %876 }
 0x1c3   : > { %v879_v6 = vpop.permute.xlu1 %878 }
 0x1c4   : > { %v882_v12 = vsel %vm425_vm1, %v875_v2, %v879_v6  ;;  %v884_v15 = vsel %vm425_vm1, %v879_v6, %v875_v2  ;;  %v1394_v2 = vld [vmem:[#allocation8 + $0x58] sm:$0xff] }
 0x1c5   : > { %v897_v19 = vmul.f32 %v890_v10, %v884_v15  ;;  %v898_v21 = vmul.f32 %v894_v41, %v882_v12  ;;  %v1528_v12 = vrot.slane %v3168_v9, %v2987_v4  ;;  %v1532_v15 = vrot.slane %v3168_v9, %v2990_v5 }
 0x1c6   : > { %v881_v16 = vpop.permute.xlu0 %880 }
 0x1c7   : > { %v883_v25 = vsel %vm425_vm1, %v877_v3, %v881_v16  ;;  %v885_v42 = vsel %vm425_vm1, %v881_v16, %v877_v3  ;;  %v1396_v32 = vpop.permute.xlu1 %1395 }
 0x1c8   : > { %v899_v20 = vmul.f32 %v890_v10, %v885_v42  ;;  %v900_v23 = vmul.f32 %v894_v41, %v883_v25  ;;  %v842_v42 = vld [vmem:[#allocation8] sm:$0xff] }
 0x1ca   : > { %v1398_v24 = vpop.permute.xlu0 %1397  ;;  %v2386_v26 = vpack.c.bf16 %v900_v23, %v898_v21  ;;  %v2388_v60 = vpack.c.bf16 %v899_v20, %v897_v19 }
 0x1cb   : > { %v1400_v28 = vpop.permute.xlu1 %1399 }
 0x1cc   : > { %2387 = vmatprep.subr.bf16.mxu1 %v2386_v26  ;;  %v1403_v30 = vsel %vm606_vm4, %v1396_v32, %v1400_v28  ;;  %v1405_v14 = vsel %vm606_vm4, %v1400_v28, %v1396_v32  ;;  %v843_v28 = vld [vmem:[#allocation8 + $0x8] sm:$0xff] }
 0x1cd   : > { %2389 = vmatpush1.bf16.msra.mxu1 %v2388_v60  ;;  %v1418_v43 = vmul.f32 %v1411_v29, %v1403_v30  ;;  %v1419_v44 = vmul.f32 %v1415_v37, %v1405_v14 }
 0x1ce   : > { %v1402_v36 = vpop.permute.xlu0 %1401 }
 0x1cf   : > { %v1404_v38 = vsel %vm606_vm4, %v1398_v24, %v1402_v36  ;;  %v1406_v39 = vsel %vm606_vm4, %v1402_v36, %v1398_v24  ;;  %v845_v40 = vpop.permute.xlu1 %844  ;;  %v1091_v36 = vrot.slane %v3111_v13, %v2990_v5 }
 0x1d0   : > { %v1420_v49 = vmul.f32 %v1411_v29, %v1404_v38  ;;  %v1421_v45 = vmul.f32 %v1415_v37, %v1406_v39  ;;  %2358 = vmatmul.mubr.msk.f32.vlgmr.msra.gmra.mrb[0].mxu1 %vm901_vm8, %v872_v35  ;;  %v1087_v35 = vrot.slane %v3111_v13, %v2987_v4 }
 0x1d1   : > { %978 = vmatprep.mubr.f32.mxu1 %v2748_v59 }
 0x1d2   : > { %v2408_v61 = vpack.c.bf16 %v1420_v49, %v1418_v43  ;;  %v847_v47 = vpop.permute.xlu0 %846  ;;  %v2406_v50 = vpack.c.bf16 %v1421_v45, %v1419_v44 }
 0x1d3   : > { %v849_v51 = vpop.permute.xlu1 %848 }
 0x1d4   : > { %2407 = vmatprep.subr.bf16.mxu0 %v2406_v50  ;;  %2359 = vmatmul.mubr.msk.f32.gmra.mrb[2].mxu1 %vm901_vm8, %v873_v46  ;;  %v852_v31 = vsel %vm373_vm0, %v845_v40, %v849_v51  ;;  %v854_v55 = vsel %vm373_vm0, %v849_v51, %v845_v40  ;;  %v1510_v40 = vld [vmem:[#allocation8 + $0x60] sm:$0xff]  ;;  %v1511_v51 = vld [vmem:[#allocation8 + $0x68] sm:$0xff] }
 0x1d5   : > { %2409 = vmatpush1.bf16.msra.mxu0 %v2408_v61  ;;  %1055 = vmatprep.mubr.f32.mxu1 %v2748_v59  ;;  %v867_v63 = vmul.f32 %v860_v52, %v854_v55  ;;  %v868_v56 = vmul.f32 %v864_v54, %v852_v31 }
 0x1d6   : > { %v851_v7 = vpop.permute.xlu0 %850 }
 0x1d7   : > { %v853_v27 = vsel %vm373_vm0, %v847_v47, %v851_v7  ;;  %v855_v34 = vsel %vm373_vm0, %v851_v7, %v847_v47  ;;  %v1513_v58 = vpop.permute.xlu1 %1512  ;;  %v1649_v7 = vrot.slane %v3177_v18, %v2990_v5 }
 0x1d8   : > { %v869_v17 = vmul.f32 %v860_v52, %v855_v34  ;;  %v870_v0 = vmul.f32 %v864_v54, %v853_v27  ;;  %2368 = vmatmul.mubr.msk.f32.vlgmr.msra.gmra.mrb[0].mxu0 %vm901_vm8, %v1393_v57  ;;  %v1645_v57 = vrot.slane %v3177_v18, %v2987_v4 }
 0x1d9   : > { %1498 = vmatprep.mubr.f32.mxu0 %v2748_v59 }
 0x1da   : > { %v2392_v3 = vpack.c.bf16 %v869_v17, %v867_v63  ;;  %v1515_v6 = vpop.permute.xlu0 %1514  ;;  %v2390_v10 = vpack.c.bf16 %v870_v0, %v868_v56 }
 0x1db   : > { %v1517_v41 = vpop.permute.xlu1 %1516 }
 0x1dc   : > { %2391 = vmatprep.subr.bf16.mxu1 %v2390_v10  ;;  %2369 = vmatmul.mubr.msk.f32.gmra.mrb[2].mxu0 %vm901_vm8, %v1394_v2  ;;  %v1520_v16 = vsel %vm661_vm5, %v1513_v58, %v1517_v41  ;;  %v1522_v25 = vsel %vm661_vm5, %v1517_v41, %v1513_v58  ;;  %v1069_v58 = vld [vmem:[#allocation8 + $0x20] sm:$0xff]  ;;  %v1070_v41 = vld [vmem:[#allocation8 + $0x28] sm:$0xff] }
 0x1dd   : > { %2393 = vmatpush1.bf16.msra.mxu1 %v2392_v3  ;;  %1609 = vmatprep.mubr.f32.mxu0 %v2748_v59  ;;  %v1535_v23 = vmul.f32 %v1528_v12, %v1520_v16  ;;  %v1536_v24 = vmul.f32 %v1532_v15, %v1522_v25 }
 0x1de   : > { %v1519_v32 = vpop.permute.xlu0 %1518 }
 0x1df   : > { %v1521_v19 = vsel %vm661_vm5, %v1515_v6, %v1519_v32  ;;  %v1523_v20 = vsel %vm661_vm5, %v1519_v32, %v1515_v6  ;;  %v1072_v21 = vpop.permute.xlu1 %1071  ;;  %v1208_v32 = vrot.slane %v3126_v22, %v2990_v5 }
 0x1e0   : > { %v1537_v26 = vmul.f32 %v1528_v12, %v1521_v19  ;;  %v1538_v60 = vmul.f32 %v1532_v15, %v1523_v20  ;;  %2360 = vmatmul.mubr.msk.f32.vlgmr.msra.gmra.mrb[0].mxu1 %vm901_vm8, %v842_v42  ;;  %v1204_v42 = vrot.slane %v3126_v22, %v2987_v4 }
 0x1e1   : > { %1061 = vmatprep.mubr.f32.mxu1 %v2748_v59 }
 0x1e2   : > { %v2412_v29 = vpack.c.bf16 %v1537_v26, %v1535_v23  ;;  %v1074_v37 = vpop.permute.xlu0 %1073  ;;  %v2410_v30 = vpack.c.bf16 %v1538_v60, %v1536_v24 }
 0x1e3   : > { %v1076_v14 = vpop.permute.xlu1 %1075 }
 0x1e4   : > { %2411 = vmatprep.subr.bf16.mxu0 %v2410_v30  ;;  %2361 = vmatmul.mubr.msk.f32.gmra.mrb[2].mxu1 %vm901_vm8, %v843_v28  ;;  %v1079_v38 = vsel %vm480_vm2, %v1072_v21, %v1076_v14  ;;  %v1081_v39 = vsel %vm480_vm2, %v1076_v14, %v1072_v21  ;;  %v1627_v21 = vld [vmem:[#allocation8 + $0x70] sm:$0xff]  ;;  %v1628_v14 = vld [vmem:[#allocation8 + $0x78] sm:$0xff] }
 0x1e5   : > { %2413 = vmatpush1.bf16.msra.mxu0 %v2412_v29  ;;  %1168 = vmatprep.mubr.f32.mxu1 %v2748_v59  ;;  %v1094_v46 = vmul.f32 %v1087_v35, %v1081_v39  ;;  %v1095_v61 = vmul.f32 %v1091_v36, %v1079_v38 }
 0x1e6   : > { %v1078_v43 = vpop.permute.xlu0 %1077 }
 0x1e7   : > { %v1080_v44 = vsel %vm480_vm2, %v1074_v37, %v1078_v43  ;;  %v1082_v49 = vsel %vm480_vm2, %v1078_v43, %v1074_v37  ;;  %v1630_v45 = vpop.permute.xlu1 %1629  ;;  %v1766_v43 = vrot.slane %v3210_v8, %v2990_v5 }
 0x1e8   : > { %v1096_v47 = vmul.f32 %v1087_v35, %v1082_v49  ;;  %v1097_v50 = vmul.f32 %v1091_v36, %v1080_v44  ;;  %2370 = vmatmul.mubr.msk.f32.vlgmr.msra.gmra.mrb[0].mxu0 %vm901_vm8, %v1510_v40  ;;  %v1762_v40 = vrot.slane %v3210_v8, %v2987_v4 }
 0x1e9   : > { %1615 = vmatprep.mubr.f32.mxu0 %v2748_v59 }
 0x1ea   : > { %v2396_v52 = vpack.c.bf16 %v1096_v47, %v1094_v46  ;;  %v1632_v54 = vpop.permute.xlu0 %1631  ;;  %v2394_v31 = vpack.c.bf16 %v1097_v50, %v1095_v61 }
 0x1eb   : > { %v1634_v55 = vpop.permute.xlu1 %1633 }
 0x1ec   : > { %2395 = vmatprep.subr.bf16.mxu1 %v2394_v31  ;;  %2371 = vmatmul.mubr.msk.f32.gmra.mrb[2].mxu0 %vm901_vm8, %v1511_v51  ;;  %v1637_v27 = vsel %vm716_vm6, %v1630_v45, %v1634_v55  ;;  %v1639_v34 = vsel %vm716_vm6, %v1634_v55, %v1630_v45  ;;  %v1186_v45 = vld [vmem:[#allocation8 + $0x30] sm:$0xff] }
 0x1ed   : > { %2397 = vmatpush1.bf16.msra.mxu1 %v2396_v52  ;;  %1726 = vmatprep.mubr.f32.mxu0 %v2748_v59  ;;  %v1652_v2 = vmul.f32 %v1645_v57, %v1637_v27  ;;  %v1653_v3 = vmul.f32 %v1649_v7, %v1639_v34 }
 0x1ee   : > { %v1636_v63 = vpop.permute.xlu0 %1635 }
 0x1ef   : > { %v1638_v56 = vsel %vm716_vm6, %v1632_v54, %v1636_v63  ;;  %v1640_v17 = vsel %vm716_vm6, %v1636_v63, %v1632_v54  ;;  %v1189_v0 = vpop.permute.xlu1 %1188  ;;  %v1187_v54 = vld [vmem:[#allocation8 + $0x38] sm:$0xff] }
 0x1f0   : > { %v1654_v6 = vmul.f32 %v1645_v57, %v1638_v56  ;;  %v1655_v10 = vmul.f32 %v1649_v7, %v1640_v17  ;;  %2362 = vmatmul.mubr.msk.f32.vlgmr.msra.gmra.mrb[0].mxu1 %vm901_vm8, %v1069_v58  ;;  %v1744_v57 = vld [vmem:[#allocation8 + $0x80] sm:$0xff]  ;;  %v1745_v7 = vld [vmem:[#allocation8 + $0x88] sm:$0xff] }
 0x1f1   : > { %1174 = vmatprep.mubr.f32.mxu1 %v2748_v59 }
 0x1f2   : > { %v2416_v12 = vpack.c.bf16 %v1654_v6, %v1652_v2  ;;  %v1191_v15 = vpop.permute.xlu0 %1190  ;;  %v2414_v16 = vpack.c.bf16 %v1655_v10, %v1653_v3 }
 0x1f3   : > { %v1193_v25 = vpop.permute.xlu1 %1192 }
 0x1f4   : > { %2415 = vmatprep.subr.bf16.mxu0 %v2414_v16  ;;  %2363 = vmatmul.mubr.msk.f32.gmra.mrb[2].mxu1 %vm901_vm8, %v1070_v41  ;;  %v1196_v19 = vsel %vm535_vm3, %v1189_v0, %v1193_v25  ;;  %v1198_v20 = vsel %vm535_vm3, %v1193_v25, %v1189_v0 }
 0x1f5   : > { %2417 = vmatpush1.bf16.msra.mxu0 %v2416_v12  ;;  %1285 = vmatprep.mubr.f32.mxu1 %v2748_v59  ;;  %v1211_v28 = vmul.f32 %v1204_v42, %v1198_v20  ;;  %v1212_v29 = vmul.f32 %v1208_v32, %v1196_v19 }
 0x1f6   : > { %v1195_v23 = vpop.permute.xlu0 %1194 }
 0x1f7   : > { %v1197_v24 = vsel %vm535_vm3, %v1191_v15, %v1195_v23  ;;  %v1199_v26 = vsel %vm535_vm3, %v1195_v23, %v1191_v15  ;;  %v1747_v60 = vpop.permute.xlu1 %1746 }
 0x1f8   : > { %v1213_v37 = vmul.f32 %v1204_v42, %v1199_v26  ;;  %v1214_v30 = vmul.f32 %v1208_v32, %v1197_v24  ;;  %2372 = vmatmul.mubr.msk.f32.vlgmr.msra.gmra.mrb[0].mxu0 %vm901_vm8, %v1627_v21 }
 0x1f9   : > { %1732 = vmatprep.mubr.f32.mxu0 %v2748_v59 }
 0x1fa   : > { %v2400_v35 = vpack.c.bf16 %v1213_v37, %v1211_v28  ;;  %v1749_v36 = vpop.permute.xlu0 %1748  ;;  %v2398_v38 = vpack.c.bf16 %v1214_v30, %v1212_v29  ;;  %v1881_v28 = vld [vmem:[%s3551_s6 + $0x8] sm:$0x1] }
 0x1fb   : > { %v1751_v39 = vpop.permute.xlu1 %1750 }
 0x1fc   : > { %2399 = vmatprep.subr.bf16.mxu1 %v2398_v38  ;;  %2373 = vmatmul.mubr.msk.f32.gmra.mrb[2].mxu0 %vm901_vm8, %v1628_v14  ;;  %v1754_v44 = vsel %vm771_vm7, %v1747_v60, %v1751_v39  ;;  %v1756_v49 = vsel %vm771_vm7, %v1751_v39, %v1747_v60  ;;  %v1880_v60 = vld [vmem:[%s3551_s6] sm:$0xff] }
 0x1fd   : > { %2401 = vmatpush1.bf16.msra.mxu1 %v2400_v35  ;;  %1843 = vmatprep.mubr.f32.mxu0 %v2748_v59  ;;  %v1769_v47 = vmul.f32 %v1762_v40, %v1754_v44  ;;  %v1770_v50 = vmul.f32 %v1766_v43, %v1756_v49 }
 0x1fe   : > { %v1753_v46 = vpop.permute.xlu0 %1752 }
 0x1ff   : > { %v1755_v61 = vsel %vm771_vm7, %v1749_v36, %v1753_v46  ;;  %v1757_v5 = vsel %vm771_vm7, %v1753_v46, %v1749_v36 }
 0x200   : > { %v1771_v51 = vmul.f32 %v1762_v40, %v1755_v61  ;;  %v1772_v52 = vmul.f32 %v1766_v43, %v1757_v5  ;;  %2364 = vmatmul.mubr.msk.f32.vlgmr.msra.gmra.mrb[0].mxu1 %vm901_vm8, %v1186_v45 }
 0x201   : > { %1291 = vmatprep.mubr.f32.mxu1 %v2748_v59 }
 0x202   : > { %v2420_v31 = vpack.c.bf16 %v1771_v51, %v1769_v47  ;;  %v2418_v55 = vpack.c.bf16 %v1772_v52, %v1770_v50  ;;  %v2215_v47 = vld [vmem:[#allocation2] sm:$0x1] }
 0x204   : > { %2365 = vmatmul.mubr.msk.f32.gmra.mrb[2].mxu1 %vm901_vm8, %v1187_v54  ;;  %2419 = vmatprep.subr.bf16.mxu0 %v2418_v55 }
 0x205   : > { %2421 = vmatpush1.bf16.msra.mxu0 %v2420_v31  ;;  %1952 = vmatprep.mubr.f32.mxu1 %v2748_v59 }
 0x208   : > { %2374 = vmatmul.mubr.msk.f32.vlgmr.msra.gmra.mrb[0].mxu0 %vm901_vm8, %v1744_v57 }
 0x209   : > { %1849 = vmatprep.mubr.f32.mxu0 %v2748_v59 }
 0x20c   : > { %2375 = vmatmul.mubr.msk.f32.gmra.mrb[2].mxu0 %vm901_vm8, %v1745_v7  ;;  %v1865_v3 = vpop.permute.xlu1 %1864 }
 0x20f   : > { %v1870_v15 = vpop.permute.xlu0 %1869 }
 0x2d3   : > { %v1287_v27 = vpop.f32.mrb[0].mxu1 }
 0x2d4   : > { %v1289_v34 = vpop.f32.mrb[1].mxu1 }
 0x2d7   : > { %v1293_v58 = vpop.f32.mrb[2].mxu1 }
 0x2d8   : > { %v1295_v63 = vpop.f32.mrb[3].mxu1 }
 0x2db   : > { %v1845_v56 = vpop.f32.mrb[0].mxu0 }
 0x2dc   : > { %v2426_v17 = vadd.f32 %v1845_v56, %v1287_v27  ;;  %v1847_v0 = vpop.f32.mrb[1].mxu0 }
 0x2dd   : > { %v2427_v2 = vadd.f32 %v1847_v0, %v1289_v34 }
 0x2de   : > { %v1872_v10 = vadd.f32 %v2426_v17, %v1865_v3 }
 0x2df   : > { %v1851_v6 = vpop.f32.mrb[2].mxu0  ;;  %v1873_v16 = vadd.f32 %v2427_v2, %v1865_v3 }
 0x2e0   : > { %v2428_v41 = vadd.f32 %v1851_v6, %v1293_v58  ;;  %v1853_v12 = vpop.f32.mrb[3].mxu0  ;;  %v1876_v19 = vmax.f32 %v1872_v10, 0.0 }
 0x2e1   : > { %v2429_v25 = vadd.f32 %v1853_v12, %v1295_v63  ;;  %v1877_v21 = vmax.f32 %v1873_v16, 0.0 }
 0x2e2   : > { %v1874_v42 = vadd.f32 %v2428_v41, %v1870_v15 }
 0x2e3   : > { %v1875_v32 = vadd.f32 %v2429_v25, %v1870_v15 }
 0x2e4   : > { %v1878_v20 = vmax.f32 %v1874_v42, 0.0 }
 0x2e5   : > { %v1879_v23 = vmax.f32 %v1875_v32, 0.0 }
 0x2e6   : > { %v2424_v24 = vpack.c.bf16 %v1878_v20, %v1876_v19 }
 0x2e7   : > { %v2422_v26 = vpack.c.bf16 %v1879_v23, %v1877_v21 }
 0x2e9   : > { %2423 = vmatprep.subr.bf16.mxu1 %v2422_v26 }
 0x2ea   : > { %2425 = vmatpush1.bf16.msra.mxu1 %v2424_v24 }
 0x2ed   : > { %2376 = vmatmul.mubr.msk.f32.vlgmr.msra.gmra.mrb[4].mxu1 %vm901_vm8, %v1880_v60 }
 0x2ee   : > { %1958 = vmatprep.mubr.f32.mxu1 %v2748_v59 }
 0x2f1   : > { %2377 = vmatmul.mubr.msk.f32.gmra.mrb[6].mxu1 %vm901_vm8, %v1881_v28 }
 0x3c0   : > { %v3396_v29 = vpop.f32.mrb[4].mxu1 }
 0x3c1   : > { %1965 = vrot.lane.b32.xlu1 %v3396_v29, %s2732_s14  ;;  %v3400_v37 = vpop.f32.mrb[5].mxu1  ;;  %v1992_v30 = vrot.slane %v3396_v29, 1  ;;  %v2022_v38 = vrot.slane %v3396_v29, 2  ;;  %v2052_v40 = vrot.slane %v3396_v29, 3  ;;  %v2099_v44 = vrot.slane %v3396_v29, 5 }
 0x3c2   : > { %1967 = vrot.lane.b32.xlu0 %v3400_v37, %s2732_s14  ;;  %v1993_v59 = vrot.slane %v3400_v37, 1  ;;  %v2082_v35 = vcombine.high %v3396_v29, %v3400_v37  ;;  %v2023_v39 = vrot.slane %v3400_v37, 2  ;;  %v2053_v43 = vrot.slane %v3400_v37, 3  ;;  %s352_s14 = scalar_lea.vmem [#allocation9], %s2347_s19  ;;  %s2749_s19 = smov [#allocation9]  }
 0x3c3   : > { %v2100_v49 = vrot.slane %v3400_v37, 5  ;;  %v2129_v45 = vrot.slane %v3396_v29, 6  ;;  %v2130_v46 = vrot.slane %v3400_v37, 6  ;;  %v2159_v61 = vrot.slane %v3396_v29, 7 }
 0x3c4   : > { %v1960_v14 = vpop.f32.mrb[6].mxu1  ;;  %v2160_v5 = vrot.slane %v3400_v37, 7 }
 0x3c5   : > { %1996 = vrot.lane.b32.xlu1 %v1992_v30, %s2731_s12  ;;  %v1962_v36 = vpop.f32.mrb[7].mxu1 }
 0x3c6   : > { %1998 = vrot.lane.b32.xlu0 %v1993_v59, %s2731_s12  ;;  %s2385_s12 = sshll.u32 %s2819_s7, 5 }
 0x3c9   : > { %2026 = vrot.lane.b32.xlu1 %v2022_v38, %s2733_s25 }
 0x3ca   : > { %2028 = vrot.lane.b32.xlu0 %v2023_v39, %s2733_s25  ;;  %s2249_s25 = sshll.u32 %s352_s14, 4  ;;  %s3503_s25 = int_to_ptr.vmem [resolvable:$true] %s2249_s25 }
 0x3cb   : > { %s2653_s7 = scalar_lea.vmem %s3503_s25, 32 }
 0x3cc   : > { %p2654_p11 = scmp.ne.s32.totalorder %s3503_s25, %s2653_s7 }
 0x3cd   : > { %2056 = vrot.lane.b32.xlu1 %v2052_v40, %s2735_s16 }
 0x3ce   : > { %2058 = vrot.lane.b32.xlu0 %v2053_v43, %s2735_s16  ;;  %p2655_p1 = pnand %p2654_p11, %p3567_p0 }
 0x3d0   : > { %p2656_p3 = pneg %p2655_p1 }
 0x3d1   : > { %2103 = vrot.lane.b32.xlu1 %v2099_v44, %s2741_s15 }
 0x3d2   : > { %2105 = vrot.lane.b32.xlu0 %v2100_v49, %s2741_s15  ;;  %s3501_s15 = scalar_lea.hbm %s3553_s8, %s2385_s12 }
 0x3d5   : > { %2133 = vrot.lane.b32.xlu1 %v2129_v45, %s2739_s27 }
 0x3d6   : > { %2135 = vrot.lane.b32.xlu0 %v2130_v46, %s2739_s27 }
 0x3d9   : > { %2163 = vrot.lane.b32.xlu1 %v2159_v61, %s2745_s24 }
 0x3da   : > { %2165 = vrot.lane.b32.xlu0 %v2160_v5, %s2745_s24  ;;  %s2657_s24 = sshll.u32 %s2749_s19, 4  ;;  %s2658_s24 = int_to_ptr.vmem [resolvable:$false] %s2657_s24 }
 0x3db   : > { %s2659_s26 = scalar_lea.vmem %s2658_s24, 64  ;;  %p2660_p7 = scmp.lt.s32.totalorder %s3503_s25, %s2658_s24 }
 0x3dc   : > { %p2661_p9 = scmp.lt.s32.totalorder %s2659_s26, %s2653_s7 }
 0x3dd   : > { %2189 = vrot.lane.b32.xlu1 %v1960_v14, %s2743_s23 }
 0x3de   : > { %2191 = vrot.lane.b32.xlu0 %v1962_v36, %s2743_s23  ;;  %s2235_s23 = scalar_lea.sflag [#allocation5], %s2967_s17  ;;  %p2662_p12 = por %p2661_p9, %p2660_p7 }
 0x3e0   : > { %p2663_p2 = pnand %p2662_p12, %p2656_p3 }
 0x3e1   : > { %2218 = vperm.xlu1 %2564, %v2215_v47  }
 0x433   : > { %v1966_v50 = vpop.permute.xlu1 %1965 }
 0x434   : > { %v1968_v51 = vpop.permute.xlu0 %1967 }
 0x435   : > { %v1969_v27 = vsel %vm373_vm0, %v1966_v50, %v1968_v51  ;;  %v1970_v34 = vsel %vm373_vm0, %v1968_v51, %v1966_v50 }
 0x436   : > { %v1973_v0 = vcombine.low %v1970_v34, %v1969_v27 }
 0x437   : > { %v1997_v52 = vpop.permute.xlu1 %1996 }
 0x438   : > { %v1999_v54 = vpop.permute.xlu0 %1998  ;;  %v1980_v16 = vrot.slane %v1973_v0, %v3072_v48 }
 0x439   : > { %v2000_v55 = vsel %vm425_vm1, %v1997_v52, %v1999_v54  ;;  %v2001_v57 = vsel %vm425_vm1, %v1999_v54, %v1997_v52 }
 0x43a   : > { %v2004_v56 = vcombine.low %v2001_v57, %v2000_v55  ;;  %v1987_v21 = vrot.slane %v1980_v16, %v3072_v48 }
 0x43b   : > { %v2027_v31 = vpop.permute.xlu1 %2026 }
 0x43c   : > { %v2029_v7 = vpop.permute.xlu0 %2028  ;;  %v2011_v41 = vrot.slane %v2004_v56, %v3072_v48  ;;  %v1989_v39 = vmul.f32 %v1987_v21, %v3092_v62  ;;  %v2089_v62 = vrot.slane %v2082_v35, %v3072_v48 }
 0x43d   : > { %v2030_v58 = vsel %vm480_vm2, %v2027_v31, %v2029_v7  ;;  %v2031_v63 = vsel %vm480_vm2, %v2029_v7, %v2027_v31 }
 0x43e   : > { %v2034_v3 = vcombine.low %v2031_v63, %v2030_v58  ;;  %v2018_v32 = vrot.slane %v2011_v41, %v3072_v48  ;;  %v2096_v37 = vrot.slane %v2089_v62, %v3072_v48 }
 0x43f   : > { %v2057_v17 = vpop.permute.xlu1 %2056 }
 0x440   : > { %v2059_v2 = vpop.permute.xlu0 %2058  ;;  %v2041_v42 = vrot.slane %v2034_v3, %v3072_v48  ;;  %v2020_v59 = vmul.f32 %v3106_v11, %v2018_v32 }
 0x441   : > { %v2060_v6 = vsel %vm535_vm3, %v2057_v17, %v2059_v2  ;;  %v2061_v10 = vsel %vm535_vm3, %v2059_v2, %v2057_v17 }
 0x442   : > { %v2064_v12 = vcombine.low %v2061_v10, %v2060_v6  ;;  %v2048_v60 = vrot.slane %v2041_v42, %v3072_v48  ;;  %v2021_v46 = vadd.f32 %v2020_v59, %v1989_v39 }
 0x443   : > { %v2104_v15 = vpop.permute.xlu1 %2103 }
 0x444   : > { %v2106_v25 = vpop.permute.xlu0 %2105  ;;  %v2071_v19 = vrot.slane %v2064_v12, %v3072_v48  ;;  %v2050_v43 = vmul.f32 %v3111_v13, %v2048_v60 }
 0x445   : > { %v2107_v23 = vsel %vm606_vm4, %v2104_v15, %v2106_v25  ;;  %v2108_v24 = vsel %vm606_vm4, %v2106_v25, %v2104_v15 }
 0x446   : > { %v2078_v14 = vrot.slane %v2071_v19, %v3072_v48  ;;  %v2111_v36 = vcombine.low %v2107_v23, %v2108_v24  ;;  %v2051_v13 = vadd.f32 %v2050_v43, %v2021_v46 }
 0x447   : > { %v2134_v20 = vpop.permute.xlu1 %2133 }
 0x448   : > { %v2136_v26 = vpop.permute.xlu0 %2135  ;;  %v2080_v61 = vmul.f32 %v3126_v22, %v2078_v14  ;;  %v2118_v11 = vrot.slane %v2111_v36, %v3072_v48 }
 0x449   : > { %v2137_v28 = vsel %vm661_vm5, %v2134_v20, %v2136_v26  ;;  %v2138_v30 = vsel %vm661_vm5, %v2136_v26, %v2134_v20 }
 0x44a   : > { %v2141_v44 = vcombine.low %v2137_v28, %v2138_v30  ;;  %v2081_v31 = vadd.f32 %v2080_v61, %v2051_v13  ;;  %v2125_v55 = vrot.slane %v2118_v11, %v3072_v48 }
 0x44b   : > { %v2164_v38 = vpop.permute.xlu1 %2163 }
 0x44c   : > { %v2166_v40 = vpop.permute.xlu0 %2165  ;;  %v2148_v51 = vrot.slane %v2141_v44, %v3072_v48  ;;  %v2127_v35 = vmul.f32 %v3151_v53, %v2125_v55  ;;  %v2098_v33 = vadd.f32 %v2096_v37, %v2081_v31 }
 0x44d   : > { %v2167_v49 = vsel %vm716_vm6, %v2164_v38, %v2166_v40  ;;  %v2168_v45 = vsel %vm716_vm6, %v2166_v40, %v2164_v38 }
 0x44e   : > { %v2171_v5 = vcombine.low %v2167_v49, %v2168_v45  ;;  %v2155_v7 = vrot.slane %v2148_v51, %v3072_v48  ;;  %v2128_v63 = vadd.f32 %v2127_v35, %v2098_v33 }
 0x44f   : > { %v2190_v47 = vpop.permute.xlu1 %2189 }
 0x450   : > { %v2192_v50 = vpop.permute.xlu0 %2191  ;;  %v2178_v57 = vrot.slane %v2171_v5, %v3072_v48  ;;  %v2157_v34 = vmul.f32 %v3168_v9, %v2155_v7 }
 0x451   : > { %v2193_v52 = vsel %vm771_vm7, %v2190_v47, %v2192_v50  ;;  %v2194_v54 = vsel %vm771_vm7, %v2192_v50, %v2190_v47 }
 0x452   : > { %v2197_v22 = vcombine.low %v2193_v52, %v2194_v54  ;;  %v2185_v27 = vrot.slane %v2178_v57, %v3072_v48  ;;  %v2158_v17 = vadd.f32 %v2157_v34, %v2128_v63 }
 0x454   : > { %v2204_v29 = vrot.slane %v2197_v22, %v3072_v48  ;;  %v2187_v56 = vmul.f32 %v3177_v18, %v2185_v27 }
 0x456   : > { %v2211_v58 = vrot.slane %v2204_v29, %v3072_v48  ;;  %v2188_v2 = vadd.f32 %v2187_v56, %v2158_v17 }
 0x458   : > { %v2213_v0 = vmul.f32 %v3210_v8, %v2211_v58 }
 0x45a   : > { %v2214_v6 = vadd.f32 %v2213_v0, %v2188_v2 }
 0x460   : > { %v2219_v3 = vpop.permute.xlu1 %2218 }
 0x461   : > { %v2224_v53 = vrot.slane %v2219_v3, %v2987_v4 }
 0x463   : > { %v2225_v10 = vadd.f32 %v2224_v53, %v2214_v6 }
 0x465   : > { %2565 = vtanh.f32 %v2225_v10 }
 0x46f   : > { %v2566_v48 = vpop.eup %2565 }
 0x470   : > { %v2378_v9 = vclamps-f32 %v2566_v48, 0.5 }
 0x472   : > { %2233 = vst.msk [vmem:[%s352_s14] sm:$0x3] %vm2231_vm9, %v2378_v9 }
 0x473   : > { %2666 = shalt.err (!%p2663_p2)
}
 0x474   : > { %s2667_s17 = scalar_lea.hbm %s3501_s15, 32  ;;  %s2671_s11 = scalar_lea.hbm %s3553_s8, 64 }
 0x475   : > { %p2668_p13 = scmp.ne.s32.totalorder %s3501_s15, %s2667_s17  ;;  %p2672_p4 = scmp.lt.u32.totalorder %s3501_s15, %s3553_s8 }
 0x476   : > { %p2673_p5 = scmp.lt.u32.totalorder %s2671_s11, %s2667_s17  ;;  %p2675_p11 = scmp.lt.u32.totalorder %s2667_s17, %s3501_s15 }
 0x477   : > { %p2669_p6 = pnand %p2668_p13, %p3567_p0 }
 0x478   : > { %p2674_p8 = por %p2673_p5, %p2672_p4 }
 0x479   : > { %p2670_p10 = pneg %p2669_p6 }
 0x47a   : > { %p2676_p1 = por %p2675_p11, %p2674_p8 }
 0x47c   : > { %p2677_p3 = pnand %p2676_p1, %p2670_p10 }
 0x47e   : > { %2680 = shalt.err (!%p2677_p3)
}
 0x47f   : > { %2468 = dma.vmem_to_hbm [thread:$0]  (%p3567_p0), %s3503_s25, 32, %s3501_s15, %s2235_s23  }
 0x480 PF: > { %s2261_s16 = sand.u32 1, %s2711_s29   ;;  %p3568_p7 = scmp.ne.s32.totalorder %s3558_s13, 0 }
 0x481   : > { %p3569_p9 = scmp.ge.s32.totalorder %s2723_s10, 2  ;;  %s2262_s27 = scalar_lea.sflag [#allocation5], %s2261_s16 }
 0x483   : > { %p2482_p12 = pnand %p3569_p9, %p3568_p7 }
 0x485   : > { %2706 = dma.done.wait (!%p2482_p12), %s2262_s27, 32  }
 0x486   : > { %2708 = vsyncadd (!%p2482_p12), %s2262_s27, 4294967264  ;;  %p24_p2 = scmp.ge.s32.totalorder %s2908_s18, 4   ;;  %s3570_s29 = smov %s2715_s30 }
 0x487   : > { %s3571_s30 = smov %s2719_s9  ;;  %s3572_s9 = smov %s2924_s22 }
 0x488   : > { %s3573_s10 = smov %s2908_s18  ;;  %26 = sbr.rel (!%p24_p2) target bundleno = 9 (0x9), region = 120 }
 0x48f   :  { %2267 = vsyncpa [#allocation4], 1 }
 0x490   :  { %2269 = vsyncpa [#allocation4 + $0x1], 1 }
 0x491   :  { %2270 = vsyncpa [#allocation7], 1 }
 0x492   :  { %2271 = vsyncpa [#allocation5], 1 }
 0x493   :  { %2273 = vsyncpa [#allocation5 + $0x1], 1 }

</bundles_post_ra>
